<compile_context>
chip_gen: v5e
topology: v5e:2x2
jax: 0.10.0
libtpu: 0.0.40
codegen_flags: <defaults>
</compile_context>

<pallas_src>
import functools

import jax
import jax.numpy as jnp
from jax.experimental import pallas as pl
from jax.experimental.pallas import tpu as pltpu


# --------------------------------------------------------------------------------------
# Kernel
# --------------------------------------------------------------------------------------
def _temporal_kernel(x_ref, w_ref, b_ref, mprev_ref, mnext_ref, o_ref, *,
                     fuse_taps, compute_dtype):
    # x_ref:     (rows, Cin)        rows = block_b * T (whole sequences, batch-aligned)
    # w_ref:     (3*Cin, Cout)      tap-major fused weights [tap0 | tap1 | tap2] along K
    # b_ref:     (1, Cout)          f32 bias
    # mprev_ref: (rows, 1)          0 where row is the first step of its sequence, else 1
    # mnext_ref: (rows, 1)          0 where row is the last  step of its sequence, else 1
    # o_ref:     (rows, Cout)
    rows, cin = x_ref.shape

    x = x_ref[...]
    if x.dtype != compute_dtype:
        x = x.astype(compute_dtype)          # in-kernel cast (bf16 path) - no extra HBM pass

    # +/- 1-row shifts on the XLU (separate slot from VALU / vld, effectively free).
    # Wrap-around rows are killed by the precomputed boundary masks, which also
    # zero the taps that would leak across sequence boundaries inside the block.
    x_prev = pltpu.roll(x, shift=1, axis=0) * mprev_ref[...]
    x_next = pltpu.roll(x, shift=rows - 1, axis=0) * mnext_ref[...]   # == shift -1

    if fuse_taps:
        # v6e/v7x (256-deep MXU): one contraction with K = 3*Cin.
        x_cat = jnp.concatenate([x_prev, x, x_next], axis=-1)          # (rows, 3*Cin)
        acc = jnp.dot(x_cat, w_ref[...], preferred_element_type=jnp.float32)
    else:
        # v5e (128-deep MXU): per-tap K=Cin is already full rate; skip the im2col concat.
        acc = jnp.dot(x_prev, w_ref[0:cin, :], preferred_element_type=jnp.float32)
        acc = acc + jnp.dot(x, w_ref[cin:2 * cin, :], preferred_element_type=jnp.float32)
        acc = acc + jnp.dot(x_next, w_ref[2 * cin:3 * cin, :],
                            preferred_element_type=jnp.float32)

    acc = acc + b_ref[...]                                              # f32 bias
    o_ref[...] = jnp.maximum(acc, 0.0).astype(o_ref.dtype)             # f32 ReLU, cast at store


# --------------------------------------------------------------------------------------
# Hardware-aware helpers
# --------------------------------------------------------------------------------------
def _device_generation():
    try:
        kind = jax.devices()[0].device_kind.lower()
    except Exception:
        return None
    for tag in ("v7", "v6", "v5"):
        if tag in kind:
            return tag
    return None


def _vmem_capacity_bytes(gen):
    try:
        return int(pltpu.get_tpu_info().vmem_capacity_bytes)
    except Exception:
        pass
    if gen in ("v5", "v6"):
        return 128 * 1024 * 1024
    return 64 * 1024 * 1024        # conservative default (v7x per-TC)


def _pick_block_b(B, T, Cin, Cout, *, in_itemsize, tmp_itemsize, out_itemsize,
                  vmem_budget, min_steps, prefer_even_grid):
    # Per-batch-element VMEM: double-buffered input AND output blocks (pipeline),
    # plus in-kernel temporaries: x (cast), x_prev, x_next, x_cat (3x), f32 acc.
    in_block = T * Cin * in_itemsize
    out_block = T * Cout * out_itemsize
    temps = T * Cin * tmp_itemsize * 6 + T * Cout * 4
    per_batch = 2 * in_block + 2 * out_block + temps
    cap = max(1, vmem_budget // max(per_batch, 1))

    # Divisors of B whose block keeps the sublane dim 8-aligned (or is the full array).
    valid = [d for d in range(1, B + 1)
             if B % d == 0 and ((d * T) % 8 == 0 or d == B)]
    affordable = [d for d in valid if d <= cap] or [min(valid)]

    def pick(cands):
        return max(cands) if cands else None

    if prefer_even_grid:
        d = pick([d for d in affordable
                  if B // d >= min_steps and (B // d) % 2 == 0])
        if d is not None:
            return d
    d = pick([d for d in affordable if B // d >= min_steps])
    if d is not None:
        return d
    d = pick([d for d in affordable if B // d >= 2])
    if d is not None:
        return d
    return max(affordable)


# --------------------------------------------------------------------------------------
# Wrapper
# --------------------------------------------------------------------------------------
def temporal_forward(x, w_torch, b_torch, *, block_b=None, matmul_dtype=None):
    """BN-WVAD Temporal forward.

    x:            (B, T, Cin)   features (pre-permute layout of the torch module)
    w_torch:      (Cout, Cin, 3) torch nn.Conv1d weight
    b_torch:      (Cout,)        torch nn.Conv1d bias
    matmul_dtype: optional, e.g. jnp.bfloat16 (recommended on v6e/v7x); the cast is done
                  in-kernel, accumulation / bias / ReLU stay float32.
    """
    B, T, Cin = x.shape
    Cout = w_torch.shape[0]
    out_dtype = x.dtype

    gen = _device_generation()
    fuse_taps = gen != "v5"            # v5e: 128-deep MXU -> per-tap dots, no im2col concat

    compute_dtype = jnp.dtype(matmul_dtype) if matmul_dtype is not None else jnp.dtype(x.dtype)

    # Lane-dense output: pad Cout to a multiple of 128 (padding lives only on the
    # grid-invariant weight/bias, so it costs no per-step HBM traffic).
    cout_p = (-(-Cout // 128)) * 128 if Cout % 128 else Cout

    # torch (Cout, Cin, 3) -> tap-major (3, Cin, Cout) -> fused (3*Cin, Cout).
    w = jnp.transpose(w_torch, (2, 1, 0)).reshape(3 * Cin, Cout)
    b = b_torch.astype(jnp.float32)
    if cout_p != Cout:
        w = jnp.pad(w, ((0, 0), (0, cout_p - Cout)))
        b = jnp.pad(b, (0, cout_p - Cout))
    w = w.astype(compute_dtype)
    b = b.reshape(1, cout_p)

    vmem_cap = _vmem_capacity_bytes(gen)
    if vmem_cap >= 100 * 1024 * 1024:          # v5e / v6e: 128 MiB physical VMEM
        vmem_limit = 64 * 1024 * 1024
    else:                                       # v7x: 64 MiB per TensorCore
        vmem_limit = 32 * 1024 * 1024
    block_budget = (vmem_limit * 3) // 4

    if block_b is None:
        block_b = _pick_block_b(
            B, T, Cin, cout_p,
            in_itemsize=jnp.dtype(x.dtype).itemsize,
            tmp_itemsize=jnp.dtype(compute_dtype).itemsize,
            out_itemsize=jnp.dtype(out_dtype).itemsize,
            vmem_budget=block_budget,
            min_steps=2 if gen == "v5" else 4,   # v5e: biggest blocks; v6e/v7x: deeper pipeline
            prefer_even_grid=(gen == "v7"),      # keep both v7x TensorCores busy
        )
    assert B % block_b == 0, (B, block_b)
    # TODO(synk): add a halo'd T-split fallback (pl.ds/Element index_map) so B=1 inference
    # still gets >=4 pipelined grid steps and both v7x TensorCores have work.

    # Fold (B, T) -> rows; free metadata reshape, no extra HBM traffic.
    x2 = x.reshape(B * T, Cin)
    rows_per_block = block_b * T
    grid = (B // block_b,)

    # Grid-invariant sequence-boundary masks, hoisted out of the hot loop.
    r = jnp.arange(rows_per_block, dtype=jnp.int32) % T
    m_prev = (r != 0).astype(compute_dtype).reshape(rows_per_block, 1)
    m_next = (r != T - 1).astype(compute_dtype).reshape(rows_per_block, 1)

    kernel = functools.partial(_temporal_kernel,
                               fuse_taps=fuse_taps,
                               compute_dtype=compute_dtype)

    def _call(single_buffer_invariants):
        inv_kwargs = {"pipeline_mode": pl.Buffered(1)} if single_buffer_invariants else {}
        return pl.pallas_call(
            kernel,
            out_shape=jax.ShapeDtypeStruct((B * T, cout_p), out_dtype),
            grid=grid,
            in_specs=[
                pl.BlockSpec((rows_per_block, Cin), lambda i: (i, 0)),      # batch-blocked rows
                pl.BlockSpec((3 * Cin, cout_p), lambda i: (0, 0), **inv_kwargs),   # weights
                pl.BlockSpec((1, cout_p), lambda i: (0, 0), **inv_kwargs),          # bias
                pl.BlockSpec((rows_per_block, 1), lambda i: (0, 0), **inv_kwargs),  # mask prev
                pl.BlockSpec((rows_per_block, 1), lambda i: (0, 0), **inv_kwargs),  # mask next
            ],
            out_specs=pl.BlockSpec((rows_per_block, cout_p), lambda i: (i, 0)),
            compiler_params=pltpu.CompilerParams(
                dimension_semantics=("parallel",),
                vmem_limit_bytes=vmem_limit,
            ),
        )(x2, w, b, m_prev, m_next)

    try:
        out2 = _call(True)
    except Exception:
        # Fallback if this JAX version rejects single-buffered (Buffered(1)) specs.
        out2 = _call(False)

    out = out2.reshape(B, T, cout_p)
    if cout_p != Cout:
        out = out[:, :, :Cout]
    return out


# --------------------------------------------------------------------------------------
# Reference + test
# --------------------------------------------------------------------------------------
def _reference(x, w_torch, b_torch):
    # Pure-JAX reference of Conv1d(k=3, s=1, p=1) + ReLU in (B, T, C) layout.
    xpad = jnp.pad(x, ((0, 0), (1, 1), (0, 0)))
    w = jnp.transpose(w_torch, (2, 1, 0))  # (3, Cin, Cout)
    T = x.shape[1]
    acc = (xpad[:, 0:T, :] @ w[0]
           + xpad[:, 1:T + 1, :] @ w[1]
           + xpad[:, 2:T + 2, :] @ w[2]) + b_torch[None, None, :]
    return jnp.maximum(acc, 0.0)


if __name__ == "__main__":
    key = jax.random.PRNGKey(0)
    # Small but TPU-friendly shapes (lane-dense channels, several batches per grid step).
    B, T, Cin, Cout = 8, 32, 128, 128

    k_x, k_w, k_b = jax.random.split(key, 3)
    x = jax.random.normal(k_x, (B, T, Cin), dtype=jnp.float32)
    w_torch = jax.random.normal(k_w, (Cout, Cin, 3), dtype=jnp.float32) * 0.05
    b_torch = jax.random.normal(k_b, (Cout,), dtype=jnp.float32) * 0.05

    ref = _reference(x, w_torch, b_torch)

    # f32 path (matches torch numerics).
    out = jax.block_until_ready(temporal_forward(x, w_torch, b_torch))
    assert out.shape == (B, T, Cout)
    assert jnp.allclose(out, ref, atol=1e-4, rtol=1e-4), float(jnp.max(jnp.abs(out - ref)))

    # bf16 matmul path (recommended on v6e/v7x): in-kernel cast, f32 accumulation.
    out_bf16 = jax.block_until_ready(
        temporal_forward(x, w_torch, b_torch, matmul_dtype=jnp.bfloat16))
    assert out_bf16.shape == (B, T, Cout)
    assert jnp.allclose(out_bf16, ref, atol=5e-2, rtol=5e-2), \
        float(jnp.max(jnp.abs(out_bf16 - ref)))

    print("KERNEL_OK")
</pallas_src>

<mosaic_0001>
module attributes {stable_mosaic.version = 11 : i64} {
  func.func @_temporal_kernel(%arg0: i32, %arg1: memref<64x128xf32, #tpu.memory_space<vmem>>, %arg2: memref<384x128xf32, #tpu.memory_space<vmem>>, %arg3: memref<1x128xf32, #tpu.memory_space<vmem>>, %arg4: memref<64x1xf32, #tpu.memory_space<vmem>>, %arg5: memref<64x1xf32, #tpu.memory_space<vmem>>, %arg6: memref<64x128xf32, #tpu.memory_space<vmem>>) attributes {dimension_semantics = [#tpu.dimension_semantics<parallel>], iteration_bounds = array<i64: 4>, scalar_prefetch = 0 : i64, scratch_operands = 0 : i64, tpu.core_type = #tpu.core_type<tc>, window_params = [{transform_indices = @transform_0, window_bounds = array<i64: 64, 128>}, {pipeline_mode = #tpu.pipeline_mode<synchronous>, transform_indices = @transform_1, window_bounds = array<i64: 384, 128>}, {pipeline_mode = #tpu.pipeline_mode<synchronous>, transform_indices = @transform_2, window_bounds = array<i64: 1, 128>}, {pipeline_mode = #tpu.pipeline_mode<synchronous>, transform_indices = @transform_3, window_bounds = array<i64: 64, 1>}, {pipeline_mode = #tpu.pipeline_mode<synchronous>, transform_indices = @transform_4, window_bounds = array<i64: 64, 1>}, {transform_indices = @transform_5, window_bounds = array<i64: 64, 128>}]} {
    %c0 = arith.constant 0 : index
    %c0_0 = arith.constant 0 : index
    %0 = vector.load %arg1[%c0, %c0_0] : memref<64x128xf32, #tpu.memory_space<vmem>>, vector<64x128xf32>
    %c1_i32 = arith.constant 1 : i32
    %1 = tpu.dynamic_rotate %0 by %c1_i32 dim 0 : vector<64x128xf32>, i32 -> vector<64x128xf32>
    %c0_1 = arith.constant 0 : index
    %c0_2 = arith.constant 0 : index
    %2 = vector.load %arg4[%c0_1, %c0_2] : memref<64x1xf32, #tpu.memory_space<vmem>>, vector<64x1xf32>
    %3 = vector.broadcast %2 : vector<64x1xf32> to vector<64x128xf32>
    %4 = arith.mulf %1, %3 : vector<64x128xf32>
    %c63_i32 = arith.constant 63 : i32
    %5 = tpu.dynamic_rotate %0 by %c63_i32 dim 0 : vector<64x128xf32>, i32 -> vector<64x128xf32>
    %c0_3 = arith.constant 0 : index
    %c0_4 = arith.constant 0 : index
    %6 = vector.load %arg5[%c0_3, %c0_4] : memref<64x1xf32, #tpu.memory_space<vmem>>, vector<64x1xf32>
    %7 = vector.broadcast %6 : vector<64x1xf32> to vector<64x128xf32>
    %8 = arith.mulf %5, %7 : vector<64x128xf32>
    %9 = tpu.concatenate %4, %0, %8 in 1 : vector<64x128xf32>, vector<64x128xf32>, vector<64x128xf32> -> vector<64x384xf32>
    %c0_5 = arith.constant 0 : index
    %c0_6 = arith.constant 0 : index
    %10 = vector.load %arg2[%c0_5, %c0_6] : memref<384x128xf32, #tpu.memory_space<vmem>>, vector<384x128xf32>
    %cst = arith.constant dense<0.000000e+00> : vector<64x128xf32>
    %11 = tpu.matmul %9, %10, %cst {dimension_numbers = #tpu.dot_dimension_numbers<[1], [0], [0], [1], [0, 0, 1, 1], [], []>} : vector<64x384xf32>, vector<384x128xf32>, vector<64x128xf32> -> vector<64x128xf32>
    %c0_7 = arith.constant 0 : index
    %c0_8 = arith.constant 0 : index
    %12 = vector.load %arg3[%c0_7, %c0_8] : memref<1x128xf32, #tpu.memory_space<vmem>>, vector<1x128xf32>
    %13 = vector.broadcast %12 : vector<1x128xf32> to vector<64x128xf32>
    %14 = arith.addf %11, %13 : vector<64x128xf32>
    %cst_9 = arith.constant 0.000000e+00 : f32
    %15 = vector.broadcast %cst_9 : f32 to vector<64x128xf32>
    %16 = arith.maximumf %14, %15 : vector<64x128xf32>
    %c0_10 = arith.constant 0 : index
    %c0_11 = arith.constant 0 : index
    %17 = vector.load %arg6[%c0_10, %c0_11] : memref<64x128xf32, #tpu.memory_space<vmem>>, vector<64x128xf32>
    tpu.vector_store %arg6[%c0_10, %c0_11], %16 {strides = array<i32>} : memref<64x128xf32, #tpu.memory_space<vmem>>, vector<64x128xf32>,
    return
  }
  func.func @transform_0(%arg0: i32) -> (i32, i32) {
    %c0_i32 = arith.constant 0 : i32
    %c0_i32_0 = arith.constant 0 : i32
    return %arg0, %c0_i32 : i32, i32
  }
  func.func @transform_1(%arg0: i32) -> (i32, i32) {
    %c0_i32 = arith.constant 0 : i32
    %c0_i32_0 = arith.constant 0 : i32
    %c0_i32_1 = arith.constant 0 : i32
    return %c0_i32, %c0_i32_0 : i32, i32
  }
  func.func @transform_2(%arg0: i32) -> (i32, i32) {
    %c0_i32 = arith.constant 0 : i32
    %c0_i32_0 = arith.constant 0 : i32
    %c0_i32_1 = arith.constant 0 : i32
    return %c0_i32, %c0_i32_0 : i32, i32
  }
  func.func @transform_3(%arg0: i32) -> (i32, i32) {
    %c0_i32 = arith.constant 0 : i32
    %c0_i32_0 = arith.constant 0 : i32
    %c0_i32_1 = arith.constant 0 : i32
    return %c0_i32, %c0_i32_0 : i32, i32
  }
  func.func @transform_4(%arg0: i32) -> (i32, i32) {
    %c0_i32 = arith.constant 0 : i32
    %c0_i32_0 = arith.constant 0 : i32
    %c0_i32_1 = arith.constant 0 : i32
    return %c0_i32, %c0_i32_0 : i32, i32
  }
  func.func @transform_5(%arg0: i32) -> (i32, i32) {
    %c0_i32 = arith.constant 0 : i32
    %c0_i32_0 = arith.constant 0 : i32
    return %arg0, %c0_i32 : i32, i32
  }
}

module attributes {stable_mosaic.version = 11 : i64} {
  func.func @_temporal_kernel(%arg0: i32, %arg1: memref<64x128xf32, #tpu.memory_space<vmem>>, %arg2: memref<384x128xf32, #tpu.memory_space<vmem>>, %arg3: memref<1x128xf32, #tpu.memory_space<vmem>>, %arg4: memref<64x1xf32, #tpu.memory_space<vmem>>, %arg5: memref<64x1xf32, #tpu.memory_space<vmem>>, %arg6: memref<64x128xf32, #tpu.memory_space<vmem>>) attributes {dimension_semantics = [#tpu.dimension_semantics<parallel>], iteration_bounds = array<i64: 4>, scalar_prefetch = 0 : i64, scratch_operands = 0 : i64, tpu.core_type = #tpu.core_type<tc>, window_params = [{transform_indices = @transform_0, window_bounds = array<i64: 64, 128>}, {pipeline_mode = #tpu.pipeline_mode<synchronous>, transform_indices = @transform_1, window_bounds = array<i64: 384, 128>}, {pipeline_mode = #tpu.pipeline_mode<synchronous>, transform_indices = @transform_2, window_bounds = array<i64: 1, 128>}, {pipeline_mode = #tpu.pipeline_mode<synchronous>, transform_indices = @transform_3, window_bounds = array<i64: 64, 1>}, {pipeline_mode = #tpu.pipeline_mode<synchronous>, transform_indices = @transform_4, window_bounds = array<i64: 64, 1>}, {transform_indices = @transform_5, window_bounds = array<i64: 64, 128>}]} {
    %c0 = arith.constant 0 : index
    %c0_0 = arith.constant 0 : index
    %0 = vector.load %arg1[%c0, %c0_0] : memref<64x128xf32, #tpu.memory_space<vmem>>, vector<64x128xf32>
    %c1_i32 = arith.constant 1 : i32
    %1 = tpu.dynamic_rotate %0 by %c1_i32 dim 0 : vector<64x128xf32>, i32 -> vector<64x128xf32>
    %c0_1 = arith.constant 0 : index
    %c0_2 = arith.constant 0 : index
    %2 = vector.load %arg4[%c0_1, %c0_2] : memref<64x1xf32, #tpu.memory_space<vmem>>, vector<64x1xf32>
    %3 = vector.broadcast %2 : vector<64x1xf32> to vector<64x128xf32>
    %4 = arith.mulf %1, %3 : vector<64x128xf32>
    %c63_i32 = arith.constant 63 : i32
    %5 = tpu.dynamic_rotate %0 by %c63_i32 dim 0 : vector<64x128xf32>, i32 -> vector<64x128xf32>
    %c0_3 = arith.constant 0 : index
    %c0_4 = arith.constant 0 : index
    %6 = vector.load %arg5[%c0_3, %c0_4] : memref<64x1xf32, #tpu.memory_space<vmem>>, vector<64x1xf32>
    %7 = vector.broadcast %6 : vector<64x1xf32> to vector<64x128xf32>
    %8 = arith.mulf %5, %7 : vector<64x128xf32>
    %9 = tpu.concatenate %4, %0, %8 in 1 : vector<64x128xf32>, vector<64x128xf32>, vector<64x128xf32> -> vector<64x384xf32>
    %c0_5 = arith.constant 0 : index
    %c0_6 = arith.constant 0 : index
    %10 = vector.load %arg2[%c0_5, %c0_6] : memref<384x128xf32, #tpu.memory_space<vmem>>, vector<384x128xf32>
    %cst = arith.constant dense<0.000000e+00> : vector<64x128xf32>
    %11 = tpu.matmul %9, %10, %cst {dimension_numbers = #tpu.dot_dimension_numbers<[1], [0], [0], [1], [0, 0, 1, 1], [], []>} : vector<64x384xf32>, vector<384x128xf32>, vector<64x128xf32> -> vector<64x128xf32>
    %c0_7 = arith.constant 0 : index
    %c0_8 = arith.constant 0 : index
    %12 = vector.load %arg3[%c0_7, %c0_8] : memref<1x128xf32, #tpu.memory_space<vmem>>, vector<1x128xf32>
    %13 = vector.broadcast %12 : vector<1x128xf32> to vector<64x128xf32>
    %14 = arith.addf %11, %13 : vector<64x128xf32>
    %cst_9 = arith.constant 0.000000e+00 : f32
    %15 = vector.broadcast %cst_9 : f32 to vector<64x128xf32>
    %16 = arith.maximumf %14, %15 : vector<64x128xf32>
    %c0_10 = arith.constant 0 : index
    %c0_11 = arith.constant 0 : index
    %17 = vector.load %arg6[%c0_10, %c0_11] : memref<64x128xf32, #tpu.memory_space<vmem>>, vector<64x128xf32>
    tpu.vector_store %arg6[%c0_10, %c0_11], %16 {strides = array<i32>} : memref<64x128xf32, #tpu.memory_space<vmem>>, vector<64x128xf32>,
    return
  }
  func.func @transform_0(%arg0: i32) -> (i32, i32) {
    %c0_i32 = arith.constant 0 : i32
    %c0_i32_0 = arith.constant 0 : i32
    return %arg0, %c0_i32 : i32, i32
  }
  func.func @transform_1(%arg0: i32) -> (i32, i32) {
    %c0_i32 = arith.constant 0 : i32
    %c0_i32_0 = arith.constant 0 : i32
    %c0_i32_1 = arith.constant 0 : i32
    return %c0_i32, %c0_i32_0 : i32, i32
  }
  func.func @transform_2(%arg0: i32) -> (i32, i32) {
    %c0_i32 = arith.constant 0 : i32
    %c0_i32_0 = arith.constant 0 : i32
    %c0_i32_1 = arith.constant 0 : i32
    return %c0_i32, %c0_i32_0 : i32, i32
  }
  func.func @transform_3(%arg0: i32) -> (i32, i32) {
    %c0_i32 = arith.constant 0 : i32
    %c0_i32_0 = arith.constant 0 : i32
    %c0_i32_1 = arith.constant 0 : i32
    return %c0_i32, %c0_i32_0 : i32, i32
  }
  func.func @transform_4(%arg0: i32) -> (i32, i32) {
    %c0_i32 = arith.constant 0 : i32
    %c0_i32_0 = arith.constant 0 : i32
    %c0_i32_1 = arith.constant 0 : i32
    return %c0_i32, %c0_i32_0 : i32, i32
  }
  func.func @transform_5(%arg0: i32) -> (i32, i32) {
    %c0_i32 = arith.constant 0 : i32
    %c0_i32_0 = arith.constant 0 : i32
    return %arg0, %c0_i32 : i32, i32
  }
}

</mosaic_0001>

<bundles_post_ra>
// kernel: tpu_custom_call.1
= control target key start
LH: loop header
LB: loop body
LE: loop exit
PB: predicated region body
PF: predicated region fallthrough
CT: control target
= control target key end

     0   :  { %10 = vsyncpa [#allocation3], 0  ;;  %s1367_s0 = inlined_call_operand.hbm [shape: f32[256,128], index: 0, kind: input, shape index: {}]   ;;  %s1368_s1 = inlined_call_operand.hbm [shape: f32[384,128], index: 1, kind: input, shape index: {}]   ;;  %s1369_s2 = inlined_call_operand.vmem [shape: f32[1,128], index: 2, kind: input, shape index: {}]   ;;  %s1370_s3 = inlined_call_operand.vmem [shape: f32[64,1], index: 3, kind: input, shape index: {}]   ;;  %s1371_s4 = inlined_call_operand.vmem [shape: f32[64,1], index: 4, kind: input, shape index: {}]   ;;  %s1372_s5 = inlined_call_operand.hbm [shape: f32[256,128], index: 5, kind: output, shape index: {}]  }
   0x1   :  { %12 = vsyncpa [#allocation3 + $0x1], 0 }
   0x2   :  { %13 = vsyncpa [#allocation6], 0 }
   0x3   :  { %14 = vsyncpa [#allocation4], 0 }
   0x4   :  { %16 = vsyncpa [#allocation4 + $0x1], 0  ;;  %s994_s18 = smov 0   ;;  %s996_s19 = smov 0  }
   0x5   :  { %s998_s20 = smov 0   ;;  %s1000_s21 = smov 0  }
   0x6 LB: > { %s1015_s22 = sadd.s32 4294967295, %s956_s21   ;;  %s710_s23 = sadd.s32 4294967294, %s956_s21   ;;  %s956_s21 = sphi %s1000_s21, %s1383_s21   ;;  %s952_s20 = sphi %s998_s20, %s1382_s20   ;;  %s948_s19 = sphi %s996_s19, %s1381_s19   ;;  %s944_s18 = sphi %s994_s18, %s1380_s18  }
   0x7   : > { %p42_p0 = scmp.ne.s32.totalorder %s948_s19, %s944_s18  ;;  %p43_p1 = scmp.eq.s32.totalorder %s1015_s22, 0 }
   0x8   : > { %p150_p2 = scmp.eq.s32.totalorder %s1015_s22, 3  ;;  %p156_p3 = scmp.eq.s32.totalorder %s710_s23, 3 }
   0x9   : > { %p1024_p4 = por %p43_p1, %p42_p0  ;;  %p711_p5 = scmp.ge.s32.totalorder %s956_s21, 1 }
   0xa   : > { %p1029_p6 = por %p156_p3, %p42_p0  ;;  %p163_p7 = scmp.lt.s32.totalorder %s956_s21, 5 }
   0xb   : > { %s174_s28 = sshll.u32 %s1368_s1, 4  ;;  %s958_s30 = smov [#allocation5]   ;;  %s175_s28 = int_to_ptr.hbm [resolvable:$true] %s174_s28 }
   0xc   : > { %p1037_p8 = pnand %p711_p5, %p163_p7  ;;  %s176_s6 = sshll.u32 %s958_s30, 4  ;;  %s177_s6 = int_to_ptr.vmem [resolvable:$true] %s176_s6 }
   0xd   : > { %s1046_s7 = sadd.s32 1, %s956_s21   ;;  %s1373_s8 = smov 128  }
   0xe   : > { %p768_p9 = pneg %p1037_p8  ;;  %s960_s9 = smov 8  }
   0xf   : > { %s26_s10 = ssub.s32 %s956_s21, %s1046_s7  ;;  %s29_s11 = sadd.s32 1, %s952_s20 }
  0x10   : > { %p769_p10 = pnand %p768_p9, %p43_p1  ;;  %p27_p11 = scmp.eq.s32.totalorder %s26_s10, 0 }
  0x11   : > { %p36_p12 = scmp.ne.s32.totalorder %s952_s20, %s948_s19  ;;  %p37_p13 = scmp.eq.s32.totalorder %s956_s21, 0 }
  0x12   : > { %771 = dma.hbm_to_vmem [thread:$0]  (!%p769_p10), %s175_s28, 6144, %s177_s6, [#allocation6], %s1373_s8, %s1373_s8, %s960_s9  }
  0x13   : > { %s1058_s12 = scalar_select %p27_p11, %s952_s20, %s29_s11  }
  0x14   : > { %p1062_p0 = por %p150_p2, %p36_p12  ;;  %p781_p3 = scmp.lt.s32.totalorder %s956_s21, 4 }
  0x15   : > { %s199_s14 = sand.u32 1, %s952_s20   ;;  %s726_s15 = sshll.u32 %s956_s21, 6 }
  0x16   : > { %p38_p5 = por %p37_p13, %p36_p12  ;;  %s714_s16 = sshll.u32 %s199_s14, 6 }
  0x17   : > { %s208_s26 = scalar_lea.hbm %s1367_s0, %s726_s15  ;;  %s203_s28 = scalar_lea.vmem [#allocation2], %s714_s16 }
  0x18   : > { %s209_s27 = sshll.u32 %s208_s26, 4  ;;  %s211_s30 = sshll.u32 %s203_s28, 4  ;;  %s210_s27 = int_to_ptr.hbm [resolvable:$true] %s209_s27  ;;  %s212_s30 = int_to_ptr.vmem [resolvable:$true] %s211_s30 }
  0x19   : > { %p1072_p7 = pnand %p781_p3, %p38_p5  ;;  %s200_s10 = scalar_lea.sflag [#allocation3], %s199_s14 }
  0x1a   : > { %s856_s11 = sshra.s32 %s210_s27, 4  ;;  %s863_s16 = scalar_lea.hbm %s1367_s0, 256  ;;  %s857_s11 = int_to_ptr.hbm [resolvable:$true] %s856_s11 }
  0x1b   : > { %s858_s8 = scalar_lea.hbm %s857_s11, 64  ;;  %p860_p9 = pneg %p1072_p7 }
  0x1c   : > { %p859_p2 = scmp.ne.s32.totalorder %s857_s11, %s858_s8  ;;  %p864_p12 = scmp.lt.s32.totalorder %s857_s11, %s1367_s0 }
  0x1d   : > { %p865_p13 = scmp.lt.s32.totalorder %s863_s16, %s858_s8 }
  0x1e   : > { %p861_p10 = pnand %p860_p9, %p859_p2 }
  0x1f   : > { %p866_p3 = por %p865_p13, %p864_p12 }
  0x20   : > { %p862_p11 = pneg %p861_p10 }
  0x22   : > { %p867_p5 = pnand %p866_p3, %p862_p11 }
  0x24   : > { %870 = shalt.err (!%p867_p5)
}
  0x25   : > { %s1379_s14 = smov 128   ;;  %223 = sbr.rel (%p1037_p8) target bundleno = 361 (0x169), region = 40 }
  0x26   : > { %775 = dma.hbm_to_vmem [thread:$0]  (!%p1072_p7), %s210_s27, 1024, %s212_s30, %s200_s10, %s1379_s14, %s1379_s14, %s960_s9  }
  0x27   : > { %s1092_s28 = sand.u32 (!%p1037_p8), 1, %s948_s19  }
  0x28   : > { %s718_s8 = sshll.u32 (!%p1037_p8), %s1092_s28, 6  ;;  %s226_s11 = scalar_lea.sflag (!%p1037_p8), [#allocation3], %s1092_s28 }
  0x29   : > { %s1098_s15 = scalar_lea.vmem (!%p1037_p8), [#allocation2], %s718_s8 }
  0x2a   : > { %931 = dma.done.wait (%p1024_p4), %s226_s11, 1024  }
  0x2b   : > { %933 = vsyncadd (%p1024_p4), %s226_s11, 4294966272 }
  0x2c   : > { %935 = dma.done.wait (%p43_p1), [#allocation6], 6144  }
  0x2d   : > { %937 = vsyncadd (%p43_p1), [#allocation6], 4294961152  ;;  %v961_v0 = vmov 0   ;;  %v366_v1 = vld [vmem:[%s1371_s4 + $0x10] sm:$0xff]  ;;  %v364_v2 = vld [vmem:[%s1371_s4] sm:$0xff]  ;;  %v280_v55 = vlaneseq  ;;  %s1324_s17 = scalar_lea.vmem [#allocation7], %s718_s8 }
  0x2e   : > { %823 = vset.pattern.permute.xlu1 %v961_v0  ;;  %822 = vset.pattern.permute.xlu0 %v961_v0  ;;  %v367_v3 = vld [vmem:[%s1371_s4 + $0x18] sm:$0xff]  ;;  %v365_v4 = vld [vmem:[%s1371_s4 + $0x8] sm:$0xff]  ;;  %v291_v5 = vld [vmem:[%s1370_s3] sm:$0xff]  ;;  %s727_s8 = sshll.u32 %s1015_s22, 6  ;;  %s624_s14 = sshll.u32 %s1324_s17, 4  ;;  %s625_s14 = int_to_ptr.vmem [resolvable:$true] %s624_s14 }
  0x2f   : > { %824 = vset.pattern.permute.xlu2 %v961_v0  ;;  %384 = vperm.xlu1 %823, %v366_v1   ;;  %v292_v6 = vld [vmem:[%s1370_s3 + $0x8] sm:$0xff]  ;;  %v1126_v7 = vld [vmem:[#allocation5 + $0xf8] sm:$0xff]  ;;  %v1128_v8 = vld [vmem:[#allocation5 + $0xf0] sm:$0xff]  ;;  %v1213_v0 = vshrl.u32 %v280_v55, 7  ;;  %s623_s26 = scalar_lea.hbm %s1372_s5, %s727_s8  ;;  %s612_s22 = scalar_lea.sflag [#allocation4], %s1092_s28 }
  0x30   : > { %374 = vperm.xlu0 %822, %v364_v2   ;;  %389 = vperm.xlu2 %824, %v367_v3   ;;  %v1131_v9 = vld [vmem:[#allocation5 + $0xe8] sm:$0xff]  ;;  %v435_v10 = vld [vmem:[#allocation5 + $0x78] sm:$0xff]  ;;  %v434_v11 = vld [vmem:[#allocation5 + $0x70] sm:$0xff]  ;;  %s626_s11 = sshll.u32 %s623_s26, 4  ;;  %s906_s24 = scalar_lea.hbm %s1372_s5, 256  ;;  %s627_s11 = int_to_ptr.hbm [resolvable:$true] %s626_s11 }
  0x31   : > { %513 = vmatpush.msra.mxu1 %v1126_v7  ;;  %728 = vmatpush.msra.mxu3 %v435_v10  ;;  %v1134_v12 = vld [vmem:[#allocation5 + $0xe0] sm:$0xff]  ;;  %v433_v13 = vld [vmem:[#allocation5 + $0x68] sm:$0xff]  ;;  %v293_v15 = vld [vmem:[%s1370_s3 + $0x10] sm:$0xff]  ;;  %vm282_vm0 = vcmp.lt.s32.totalorder %v1213_v0, 1  ;;  %vm355_vm1 = vcmp.lt.s32.totalorder %v1213_v0, 7  ;;  %s900_s29 = sshra.s32 %s627_s11, 4  ;;  %s901_s29 = int_to_ptr.hbm [resolvable:$true] %s900_s29 }
  0x32   : > { %472 = vmatpush.msra.mxu0 %v435_v10  ;;  %v368_v14 = vld [vmem:[%s1371_s4 + $0x20] sm:$0xff]  ;;  %v297_v16 = vld [vmem:[%s1370_s3 + $0x30] sm:$0xff]  ;;  %v1146_v17 = vld [vmem:[#allocation5 + $0xd8] sm:$0xff]  ;;  %s902_s9 = scalar_lea.hbm %s901_s29, 64  ;;  %p907_p7 = scmp.lt.s32.totalorder %s901_s29, %s1372_s5 }
  0x33   : > { %514 = vmatpush.msra.mxu1 %v1128_v8  ;;  %729 = vmatpush.msra.mxu3 %v434_v11  ;;  %v432_v18 = vld [vmem:[#allocation5 + $0x60] sm:$0xff]  ;;  %v467_v19 = vld [vmem:[#allocation5 + $0x178] sm:$0xff]  ;;  %v1149_v20 = vld [vmem:[#allocation5 + $0xd0] sm:$0xff]  ;;  %p903_p1 = scmp.ne.s32.totalorder %s901_s29, %s902_s9  ;;  %p908_p2 = scmp.lt.s32.totalorder %s906_s24, %s902_s9 }
  0x34   : > { %473 = vmatpush.msra.mxu0 %v434_v11  ;;  %v431_v21 = vld [vmem:[#allocation5 + $0x58] sm:$0xff]  ;;  %v466_v22 = vld [vmem:[#allocation5 + $0x170] sm:$0xff]  ;;  %v1152_v23 = vld [vmem:[#allocation5 + $0xc8] sm:$0xff]  ;;  %554 = vmatpush.msra.mxu2 %v467_v19 }
  0x35   : > { %515 = vmatpush.msra.mxu1 %v1131_v9  ;;  %730 = vmatpush.msra.mxu3 %v433_v13  ;;  %v430_v24 = vld [vmem:[#allocation5 + $0x50] sm:$0xff]  ;;  %v465_v25 = vld [vmem:[#allocation5 + $0x168] sm:$0xff]  ;;  %v1155_v26 = vld [vmem:[#allocation5 + $0xc0] sm:$0xff]  ;;  %p904_p4 = pnand %p903_p1, %p1062_p0  ;;  %p909_p9 = por %p908_p2, %p907_p7 }
  0x36   : > { %474 = vmatpush.msra.mxu0 %v433_v13  ;;  %555 = vmatpush.msra.mxu2 %v466_v22  ;;  %v369_v27 = vld [vmem:[%s1371_s4 + $0x28] sm:$0xff]  ;;  %v294_v28 = vld [vmem:[%s1370_s3 + $0x18] sm:$0xff]  ;;  %v464_v32 = vld [vmem:[#allocation5 + $0x160] sm:$0xff] }
  0x37   : > { %301 = vperm.xlu1 %823, %v291_v5   ;;  %516 = vmatpush.msra.mxu1 %v1134_v12  ;;  %v298_v29 = vld [vmem:[%s1370_s3 + $0x38] sm:$0xff]  ;;  %v429_v31 = vld [vmem:[#allocation5 + $0x48] sm:$0xff]  ;;  %v1170_v33 = vld [vmem:[#allocation5 + $0xb0] sm:$0xff]  ;;  %p905_p8 = pneg %p904_p4 }
  0x38   : > { %379 = vperm.xlu0 %822, %v365_v4   ;;  %306 = vperm.xlu2 %824, %v292_v6   ;;  %v1167_v30 = vld [vmem:[#allocation5 + $0xb8] sm:$0xff]  ;;  %v428_v34 = vld [vmem:[#allocation5 + $0x40] sm:$0xff]  ;;  %v1173_v36 = vld [vmem:[#allocation5 + $0xa8] sm:$0xff] }
  0x39   : > { %517 = vmatpush.msra.mxu1 %v1146_v17  ;;  %731 = vmatpush.msra.mxu3 %v432_v18  ;;  %v463_v35 = vld [vmem:[#allocation5 + $0x158] sm:$0xff]  ;;  %v462_v38 = vld [vmem:[#allocation5 + $0x150] sm:$0xff]  ;;  %v1176_v39 = vld [vmem:[#allocation5 + $0xa0] sm:$0xff]  ;;  %p910_p10 = pnand %p909_p9, %p905_p8 }
  0x3a   : > { %475 = vmatpush.msra.mxu0 %v432_v18  ;;  %556 = vmatpush.msra.mxu2 %v465_v25  ;;  %v427_v37 = vld [vmem:[#allocation5 + $0x38] sm:$0xff]  ;;  %v370_v40 = vld [vmem:[%s1371_s4 + $0x30] sm:$0xff]  ;;  %v295_v41 = vld [vmem:[%s1370_s3 + $0x20] sm:$0xff] }
  0x3b   : > { %518 = vmatpush.msra.mxu1 %v1149_v20  ;;  %732 = vmatpush.msra.mxu3 %v431_v21  ;;  %v371_v42 = vld [vmem:[%s1371_s4 + $0x38] sm:$0xff]  ;;  %v426_v44 = vld [vmem:[#allocation5 + $0x30] sm:$0xff]  ;;  %v461_v45 = vld [vmem:[#allocation5 + $0x148] sm:$0xff] }
  0x3c   : > { %476 = vmatpush.msra.mxu0 %v431_v21  ;;  %557 = vmatpush.msra.mxu2 %v464_v32  ;;  %v1188_v43 = vld [vmem:[#allocation5 + $0x98] sm:$0xff]  ;;  %v1191_v46 = vld [vmem:[#allocation5 + $0x90] sm:$0xff]  ;;  %v425_v47 = vld [vmem:[#allocation5 + $0x28] sm:$0xff] }
  0x3d   : > { %519 = vmatpush.msra.mxu1 %v1152_v23  ;;  %733 = vmatpush.msra.mxu3 %v430_v24  ;;  %v460_v48 = vld [vmem:[#allocation5 + $0x140] sm:$0xff]  ;;  %v1194_v49 = vld [vmem:[#allocation5 + $0x88] sm:$0xff]  ;;  %v423_v54 = vld [vmem:[#allocation5 + $0x18] sm:$0xff] }
  0x3e   : > { %477 = vmatpush.msra.mxu0 %v430_v24  ;;  %558 = vmatpush.msra.mxu2 %v463_v35  ;;  %v424_v50 = vld [vmem:[#allocation5 + $0x20] sm:$0xff]  ;;  %v296_v52 = vld [vmem:[%s1370_s3 + $0x28] sm:$0xff]  ;;  %v422_v56 = vld [vmem:[#allocation5 + $0x10] sm:$0xff] }
  0x3f   : > { %311 = vperm.xlu1 %823, %v293_v15   ;;  %520 = vmatpush.msra.mxu1 %v1155_v26  ;;  %v1197_v51 = vld [vmem:[#allocation5 + $0x80] sm:$0xff]  ;;  %v459_v57 = vld [vmem:[#allocation5 + $0x138] sm:$0xff]  ;;  %v421_v58 = vld [vmem:[#allocation5 + $0x8] sm:$0xff] }
  0x40   : > { %394 = vperm.xlu0 %822, %v368_v14   ;;  %331 = vperm.xlu2 %824, %v297_v16   ;;  %v1204_v53 = vld [vmem:[%s1098_s15] sm:$0xff]  ;;  %v1209_v59 = vld [vmem:[%s1098_s15 + $0x8] sm:$0xff]  ;;  %v458_v60 = vld [vmem:[#allocation5 + $0x130] sm:$0xff] }
  0x41   : > { %521 = vmatpush.msra.mxu1 %v1167_v30  ;;  %734 = vmatpush.msra.mxu3 %v429_v31  ;;  %v420_v61 = vld [vmem:[#allocation5] sm:$0xff]  ;;  %v457_v62 = vld [vmem:[#allocation5 + $0x128] sm:$0xff]  ;;  %v273_v63 = vrot.slane %v1209_v59, 7  ;;  %v272_v2 = vrot.slane %v1204_v53, 7  ;;  %v455_v4 = vld [vmem:[#allocation5 + $0x118] sm:$0xff]  ;;  %v348_v24 = vrot.slane %v1209_v59, 1 }
  0x42   : > { %478 = vmatpush.msra.mxu0 %v429_v31  ;;  %559 = vmatpush.msra.mxu2 %v462_v38  ;;  %v456_v1 = vld [vmem:[#allocation5 + $0x120] sm:$0xff]  ;;  %v1226_v5 = vld [vmem:[%s1098_s15 + $0x10] sm:$0xff]  ;;  %v1233_v10 = vld [vmem:[%s1098_s15 + $0x18] sm:$0xff] }
  0x43   : > { %522 = vmatpush.msra.mxu1 %v1170_v33  ;;  %735 = vmatpush.msra.mxu3 %v428_v34  ;;  %v1222_v3 = vsel %vm282_vm0, %v272_v2, %v273_v63  ;;  %v454_v6 = vld [vmem:[#allocation5 + $0x110] sm:$0xff]  ;;  %v274_v13 = vrot.slane %v1226_v5, 7  ;;  %v275_v19 = vrot.slane %v1233_v10, 7 }
  0x44   : > { %479 = vmatpush.msra.mxu0 %v428_v34  ;;  %560 = vmatpush.msra.mxu2 %v461_v45  ;;  %v1257_v14 = vld [vmem:[%s1098_s15 + $0x30] sm:$0xff] }
  0x45   : > { %523 = vmatpush.msra.mxu1 %v1173_v36  ;;  %736 = vmatpush.msra.mxu3 %v427_v37  ;;  %v288_v15 = vsel %vm282_vm0, %v273_v63, %v274_v13  ;;  %v278_v18 = vrot.slane %v1257_v14, 7  ;;  %v287_v21 = vsel %vm282_vm0, %v274_v13, %v275_v19 }
  0x46   : > { %480 = vmatpush.msra.mxu0 %v427_v37  ;;  %561 = vmatpush.msra.mxu2 %v460_v48 }
  0x47   : > { %316 = vperm.xlu1 %823, %v294_v28   ;;  %524 = vmatpush.msra.mxu1 %v1176_v39 }
  0x48   : > { %399 = vperm.xlu0 %822, %v369_v27   ;;  %336 = vperm.xlu2 %824, %v298_v29  }
  0x49   : > { %525 = vmatpush.msra.mxu1 %v1188_v43  ;;  %737 = vmatpush.msra.mxu3 %v426_v44 }
  0x4a   : > { %481 = vmatpush.msra.mxu0 %v426_v44  ;;  %562 = vmatpush.msra.mxu2 %v459_v57  ;;  %v350_v44 = vrot.slane %v1233_v10, 1 }
  0x4b   : > { %526 = vmatpush.msra.mxu1 %v1191_v46  ;;  %738 = vmatpush.msra.mxu3 %v425_v47 }
  0x4c   : > { %482 = vmatpush.msra.mxu0 %v425_v47  ;;  %563 = vmatpush.msra.mxu2 %v458_v60 }
  0x4d   : > { %527 = vmatpush.msra.mxu1 %v1194_v49  ;;  %739 = vmatpush.msra.mxu3 %v424_v50 }
  0x4e   : > { %483 = vmatpush.msra.mxu0 %v424_v50  ;;  %564 = vmatpush.msra.mxu2 %v457_v62 }
  0x4f   : > { %321 = vperm.xlu1 %823, %v295_v41   ;;  %528 = vmatpush.msra.mxu1 %v1197_v51 }
  0x50   : > { %404 = vperm.xlu0 %822, %v370_v40   ;;  %409 = vperm.xlu2 %824, %v371_v42  }
  0x51   : > { %529 = vmatmul.f32.vlgmr.msra.gmra.mxu1 %v1204_v53  ;;  %740 = vmatpush.msra.mxu3 %v423_v54 }
  0x52   : > { %484 = vmatpush.msra.mxu0 %v423_v54  ;;  %565 = vmatpush.msra.mxu2 %v456_v1 }
  0x53   : > { %741 = vmatpush.msra.mxu3 %v422_v56 }
  0x54   : > { %485 = vmatpush.msra.mxu0 %v422_v56  ;;  %566 = vmatpush.msra.mxu2 %v455_v4 }
  0x55   : > { %742 = vmatpush.msra.mxu3 %v421_v58 }
  0x56   : > { %486 = vmatpush.msra.mxu0 %v421_v58  ;;  %567 = vmatpush.msra.mxu2 %v454_v6 }
  0x57   : > { %743 = vmatpush.msra.mxu3 %v420_v61 }
  0x58   : > { %326 = vperm.xlu0 %822, %v296_v52   ;;  %487 = vmatpush.msra.mxu0 %v420_v61  ;;  %v353_v61 = vrot.slane %v1257_v14, 1 }
  0x59   : > { %532 = vmatmul.f32.gmra.mxu1 %v1209_v59  ;;  %744 = vmatpush.msrb.mxu3 %v1126_v7  ;;  %v453_v7 = vld [vmem:[#allocation5 + $0x108] sm:$0xff] }
  0x5a   : > { %568 = vmatpush.msra.mxu2 %v453_v7 }
  0x5b   : > { %745 = vmatpush.msrb.mxu3 %v1128_v8  ;;  %v1241_v8 = vld [vmem:[%s1098_s15 + $0x20] sm:$0xff] }
  0x5c   : > { %v276_v29 = vrot.slane %v1241_v8, 7  ;;  %v351_v50 = vrot.slane %v1241_v8, 1 }
  0x5d   : > { %746 = vmatpush.msrb.mxu3 %v1131_v9  ;;  %v452_v9 = vld [vmem:[#allocation5 + $0x100] sm:$0xff] }
  0x5e   : > { %569 = vmatpush.msra.mxu2 %v452_v9 }
  0x5f   : > { %747 = vmatpush.msrb.mxu3 %v1134_v12  ;;  %v1250_v12 = vld [vmem:[%s1098_s15 + $0x28] sm:$0xff] }
  0x60   : > { %v352_v55 = vrot.slane %v1250_v12, 1 }
  0x61   : > { %535 = vmatmul.f32.gmra.mxu1 %v1226_v5  ;;  %748 = vmatpush.msrb.mxu3 %v1146_v17  ;;  %v277_v17 = vrot.slane %v1250_v12, 7 }
  0x62   : > { %v358_v58 = vsel %vm355_vm1, %v351_v50, %v352_v55  ;;  %v357_v63 = vsel %vm355_vm1, %v352_v55, %v353_v61 }
  0x63   : > { %749 = vmatpush.msrb.mxu3 %v1149_v20  ;;  %v284_v20 = vsel %vm282_vm0, %v277_v17, %v278_v18  ;;  %v285_v7 = vsel %vm282_vm0, %v276_v29, %v277_v17 }
  0x65   : > { %750 = vmatpush.msrb.mxu3 %v1152_v23  ;;  %v347_v23 = vrot.slane %v1204_v53, 1 }
  0x67   : > { %751 = vmatpush.msrb.mxu3 %v1155_v26  ;;  %v1274_v26 = vld [vmem:[%s1098_s15 + $0x38] sm:$0xff]  ;;  %v362_v28 = vsel %vm355_vm1, %v347_v23, %v348_v24 }
  0x68   : > { %v279_v27 = vrot.slane %v1274_v26, 7  ;;  %v354_v4 = vrot.slane %v1274_v26, 1 }
  0x69   : > { %538 = vmatmul.f32.gmra.mxu1 %v1233_v10  ;;  %752 = vmatpush.msrb.mxu3 %v1167_v30 }
  0x6a   : > { %v283_v30 = vsel %vm282_vm0, %v278_v18, %v279_v27 }
  0x6b   : > { %753 = vmatpush.msrb.mxu3 %v1170_v33  ;;  %v286_v33 = vsel %vm282_vm0, %v275_v19, %v276_v29 }
  0x6d   : > { %754 = vmatpush.msrb.mxu3 %v1173_v36  ;;  %v349_v36 = vrot.slane %v1226_v5, 1  ;;  %v356_v5 = vsel %vm355_vm1, %v353_v61, %v354_v4 }
  0x6f   : > { %755 = vmatpush.msrb.mxu3 %v1176_v39  ;;  %v361_v38 = vsel %vm355_vm1, %v348_v24, %v349_v36  ;;  %v290_v39 = vsel %vm282_vm0, %v279_v27, %v272_v2  ;;  %v360_v45 = vsel %vm355_vm1, %v349_v36, %v350_v44 }
  0x71   : > { %541 = vmatmul.f32.gmra.mxu1 %v1241_v8  ;;  %756 = vmatpush.msrb.mxu3 %v1188_v43 }
  0x73   : > { %757 = vmatpush.msrb.mxu3 %v1191_v46 }
  0x75   : > { %758 = vmatpush.msrb.mxu3 %v1194_v49 }
  0x77   : > { %759 = vmatpush.msrb.mxu3 %v1197_v51  ;;  %v359_v51 = vsel %vm355_vm1, %v350_v44, %v351_v50 }
  0x79   : > { %544 = vmatmul.f32.gmra.mxu1 %v1250_v12  ;;  %v825_v12 = vld [vmem:[%s1369_s2] ss:$0 sm:$0xff] }
  0x81   : > { %547 = vmatmul.f32.gmra.mxu1 %v1257_v14 }
  0x8a   : > { %v390_v11 = vpop.permute.xlu2 %389 }
  0x8b   : > { %v415_v52 = vmul.f32 %v390_v11, %v359_v51  ;;  %v363_v11 = vsel %vm355_vm1, %v354_v4, %v347_v23 }
  0x92   : > { %v307_v16 = vpop.permute.xlu2 %306 }
  0x93   : > { %v340_v46 = vmul.f32 %v307_v16, %v1222_v3 }
  0x9a   : > { %v332_v22 = vpop.permute.xlu2 %331 }
  0x9b   : > { %v345_v25 = vmul.f32 %v332_v22, %v284_v20 }
  0x9d   : > { %506 = vmatmul.f32.vlgmr.msra.gmra.mxu3 %v345_v25 }
  0xa1   : > { %v385_v31 = vpop.permute.xlu1 %384 }
  0xa2   : > { %v375_v32 = vpop.permute.xlu0 %374  ;;  %v337_v35 = vpop.permute.xlu2 %336  ;;  %v414_v48 = vmul.f32 %v385_v31, %v360_v45 }
  0xa3   : > { %v412_v34 = vmul.f32 %v375_v32, %v362_v28  ;;  %v346_v37 = vmul.f32 %v337_v35, %v283_v30 }
  0xa5   : > { %570 = vmatmul.f32.vlgmr.msra.gmra.mxu2 %v412_v34  ;;  %509 = vmatmul.f32.gmra.mxu3 %v346_v37 }
  0xa9   : > { %v302_v41 = vpop.permute.xlu1 %301 }
  0xaa   : > { %v380_v40 = vpop.permute.xlu0 %379  ;;  %v339_v43 = vmul.f32 %v302_v41, %v290_v39  ;;  %v410_v9 = vpop.permute.xlu2 %409 }
  0xab   : > { %v413_v42 = vmul.f32 %v380_v40, %v361_v38  ;;  %v419_v13 = vmul.f32 %v410_v9, %v363_v11 }
  0xac   : > { %488 = vmatmul.f32.vlgmr.msra.gmra.mxu0 %v339_v43 }
  0xad   : > { %573 = vmatmul.f32.gmra.mxu2 %v413_v42  ;;  %550 = vmatmul.f32.vlgmr.msrb.gmra.mxu3 %v1274_v26 }
  0xb1   : > { %v312_v49 = vpop.permute.xlu1 %311 }
  0xb2   : > { %v395_v47 = vpop.permute.xlu0 %394  ;;  %v341_v54 = vmul.f32 %v312_v49, %v288_v15 }
  0xb3   : > { %v416_v59 = vmul.f32 %v395_v47, %v358_v58 }
  0xb4   : > { %491 = vmatmul.f32.gmra.mxu0 %v340_v46 }
  0xb5   : > { %576 = vmatmul.f32.gmra.mxu2 %v414_v48 }
  0xb9   : > { %v317_v57 = vpop.permute.xlu1 %316 }
  0xba   : > { %v400_v56 = vpop.permute.xlu0 %399  ;;  %v342_v60 = vmul.f32 %v317_v57, %v287_v21 }
  0xbb   : > { %v417_v2 = vmul.f32 %v400_v56, %v357_v63 }
  0xbc   : > { %494 = vmatmul.f32.gmra.mxu0 %v341_v54 }
  0xbd   : > { %579 = vmatmul.f32.gmra.mxu2 %v415_v52 }
  0xc1   : > { %v322_v1 = vpop.permute.xlu1 %321 }
  0xc2   : > { %v405_v62 = vpop.permute.xlu0 %404  ;;  %v343_v3 = vmul.f32 %v322_v1, %v286_v33 }
  0xc3   : > { %v418_v10 = vmul.f32 %v405_v62, %v356_v5 }
  0xc4   : > { %497 = vmatmul.f32.gmra.mxu0 %v342_v60 }
  0xc5   : > { %582 = vmatmul.f32.gmra.mxu2 %v416_v59 }
  0xca   : > { %v327_v6 = vpop.permute.xlu0 %326 }
  0xcb   : > { %v344_v8 = vmul.f32 %v327_v6, %v285_v7 }
  0xcc   : > { %500 = vmatmul.f32.gmra.mxu0 %v343_v3 }
  0xcd   : > { %585 = vmatmul.f32.gmra.mxu2 %v417_v2 }
  0xce   : > { %v530_v14 = vpop.f32.mrf.mxu1 }
  0xd4   : > { %503 = vmatmul.f32.gmra.mxu0 %v344_v8 }
  0xd5   : > { %588 = vmatmul.f32.gmra.mxu2 %v418_v10 }
  0xd6   : > { %v533_v15 = vpop.f32.mrf.mxu1 }
  0xdd   : > { %591 = vmatmul.f32.gmra.mxu2 %v419_v13 }
  0xde   : > { %v536_v19 = vpop.f32.mrf.mxu1 }
  0xe6   : > { %v539_v25 = vpop.f32.mrf.mxu1 }
  0xee   : > { %v542_v33 = vpop.f32.mrf.mxu1 }
  0xf6   : > { %v545_v43 = vpop.f32.mrf.mxu1 }
  0xfe   : > { %v548_v55 = vpop.f32.mrf.mxu1 }
 0x120   : > { %v507_v40 = vpop.f32.mrf.mxu3 }
 0x121   : > { %v508_v52 = vadd.f32 %v825_v12, %v507_v40 }
 0x123   : > { %v549_v57 = vadd.f32 %v548_v55, %v508_v52 }
 0x128   : > { %v571_v16 = vpop.f32.mrf.mxu2  ;;  %v510_v50 = vpop.f32.mrf.mxu3 }
 0x129   : > { %v489_v17 = vpop.f32.mrf.mxu0  ;;  %v511_v62 = vadd.f32 %v825_v12, %v510_v50 }
 0x12a   : > { %v490_v18 = vadd.f32 %v825_v12, %v489_v17 }
 0x12c   : > { %v531_v20 = vadd.f32 %v530_v14, %v490_v18 }
 0x12e   : > { %v572_v21 = vadd.f32 %v571_v16, %v531_v20 }
 0x130   : > { %v574_v22 = vpop.f32.mrf.mxu2  ;;  %v595_v53 = vmax.f32 %v572_v21, 0.0  ;;  %v551_v1 = vpop.f32.mrf.mxu3 }
 0x131   : > { %v492_v24 = vpop.f32.mrf.mxu0  ;;  %v552_v2 = vadd.f32 %v551_v1, %v511_v62 }
 0x132   : > { %603 = vst [vmem:[%s1324_s17] sm:$0xff] %v595_v53  ;;  %v493_v0 = vadd.f32 %v825_v12, %v492_v24 }
 0x134   : > { %v534_v23 = vadd.f32 %v533_v15, %v493_v0 }
 0x136   : > { %v575_v26 = vadd.f32 %v574_v22, %v534_v23 }
 0x138   : > { %v577_v27 = vpop.f32.mrf.mxu2  ;;  %v596_v28 = vmax.f32 %v575_v26, 0.0 }
 0x139   : > { %v495_v29 = vpop.f32.mrf.mxu0 }
 0x13a   : > { %604 = vst [vmem:[%s1324_s17 + $0x8] sm:$0xff] %v596_v28  ;;  %v496_v30 = vadd.f32 %v825_v12, %v495_v29 }
 0x13c   : > { %v537_v31 = vadd.f32 %v536_v19, %v496_v30 }
 0x13e   : > { %v578_v32 = vadd.f32 %v577_v27, %v537_v31 }
 0x140   : > { %v580_v34 = vpop.f32.mrf.mxu2  ;;  %v597_v35 = vmax.f32 %v578_v32, 0.0 }
 0x141   : > { %v498_v36 = vpop.f32.mrf.mxu0 }
 0x142   : > { %605 = vst [vmem:[%s1324_s17 + $0x10] sm:$0xff] %v597_v35  ;;  %v499_v37 = vadd.f32 %v825_v12, %v498_v36 }
 0x144   : > { %v540_v38 = vadd.f32 %v539_v25, %v499_v37 }
 0x146   : > { %v581_v39 = vadd.f32 %v580_v34, %v540_v38 }
 0x148   : > { %v583_v41 = vpop.f32.mrf.mxu2  ;;  %v598_v42 = vmax.f32 %v581_v39, 0.0 }
 0x149   : > { %v501_v44 = vpop.f32.mrf.mxu0 }
 0x14a   : > { %606 = vst [vmem:[%s1324_s17 + $0x18] sm:$0xff] %v598_v42  ;;  %v502_v45 = vadd.f32 %v825_v12, %v501_v44 }
 0x14c   : > { %v543_v46 = vadd.f32 %v542_v33, %v502_v45 }
 0x14e   : > { %v584_v47 = vadd.f32 %v583_v41, %v543_v46 }
 0x150   : > { %v586_v48 = vpop.f32.mrf.mxu2  ;;  %v599_v49 = vmax.f32 %v584_v47, 0.0 }
 0x151   : > { %v504_v51 = vpop.f32.mrf.mxu0 }
 0x152   : > { %607 = vst [vmem:[%s1324_s17 + $0x20] sm:$0xff] %v599_v49  ;;  %v505_v54 = vadd.f32 %v825_v12, %v504_v51 }
 0x154   : > { %v546_v56 = vadd.f32 %v545_v43, %v505_v54 }
 0x156   : > { %v587_v58 = vadd.f32 %v586_v48, %v546_v56 }
 0x158   : > { %v589_v59 = vpop.f32.mrf.mxu2  ;;  %v600_v60 = vmax.f32 %v587_v58, 0.0 }
 0x159   : > { %v590_v61 = vadd.f32 %v589_v59, %v549_v57 }
 0x15a   : > { %608 = vst [vmem:[%s1324_s17 + $0x28] sm:$0xff] %v600_v60 }
 0x15b   : > { %v601_v63 = vmax.f32 %v590_v61, 0.0 }
 0x15d   : > { %609 = vst [vmem:[%s1324_s17 + $0x30] sm:$0xff] %v601_v63 }
 0x160   : > { %v592_v3 = vpop.f32.mrf.mxu2 }
 0x161   : > { %v593_v4 = vadd.f32 %v592_v3, %v552_v2 }
 0x163   : > { %v602_v5 = vmax.f32 %v593_v4, 0.0 }
 0x165   : > { %610 = vst [vmem:[%s1324_s17 + $0x38] sm:$0xff] %v602_v5 }
 0x166   : > { %913 = shalt.err (!%p910_p10)
}
 0x167   : > { %s962_s28 = smov 128   ;;  %s963_s10 = smov 8  }
 0x168   : > { %766 = dma.vmem_to_hbm [thread:$0]  (%p1062_p0), %s625_s14, 1024, %s627_s11, %s612_s22, %s962_s28, %s962_s28, %s963_s10  }
 0x169 PF: > { %p783_p11 = scmp.ge.s32.totalorder %s956_s21, 2  ;;  %s641_s17 = sand.u32 1, %s944_s18  }
 0x16a   : > { %s642_s8 = scalar_lea.sflag [#allocation4], %s641_s17 }
 0x16b   : > { %p777_p12 = pnand %p783_p11, %p1029_p6 }
 0x16d   : > { %p778_p13 = pneg %p777_p12 }
 0x16f   : > { %939 = dma.done.wait (%p778_p13), %s642_s8, 1024  }
 0x170   : > { %941 = vsyncadd (%p778_p13), %s642_s8, 4294966272  ;;  %p19_p3 = scmp.ge.s32.totalorder %s1046_s7, 6   ;;  %s1380_s18 = smov %s948_s19 }
 0x171   : > { %s1381_s19 = smov %s952_s20  ;;  %s1382_s20 = smov %s1058_s12 }
 0x172   : > { %s1383_s21 = smov %s1046_s7  ;;  %21 = sbr.rel (!%p19_p3) target bundleno = 6 (0x6), region = 89 }
 0x177   :  { %648 = vsyncpa [#allocation3], 1 }
 0x178   :  { %650 = vsyncpa [#allocation3 + $0x1], 1 }
 0x179   :  { %651 = vsyncpa [#allocation6], 1 }
 0x17a   :  { %652 = vsyncpa [#allocation4], 1 }
 0x17b   :  { %654 = vsyncpa [#allocation4 + $0x1], 1 }

// kernel: tpu_custom_call.1
= control target key start
LH: loop header
LB: loop body
LE: loop exit
PB: predicated region body
PF: predicated region fallthrough
CT: control target
= control target key end

     0   :  { %10 = vsyncpa [#allocation3], 0  ;;  %s1367_s0 = inlined_call_operand.hbm [shape: f32[256,128], index: 0, kind: input, shape index: {}]   ;;  %s1368_s1 = inlined_call_operand.hbm [shape: f32[384,128], index: 1, kind: input, shape index: {}]   ;;  %s1369_s2 = inlined_call_operand.vmem [shape: f32[1,128], index: 2, kind: input, shape index: {}]   ;;  %s1370_s3 = inlined_call_operand.vmem [shape: f32[64,1], index: 3, kind: input, shape index: {}]   ;;  %s1371_s4 = inlined_call_operand.vmem [shape: f32[64,1], index: 4, kind: input, shape index: {}]   ;;  %s1372_s5 = inlined_call_operand.hbm [shape: f32[256,128], index: 5, kind: output, shape index: {}]  }
   0x1   :  { %12 = vsyncpa [#allocation3 + $0x1], 0 }
   0x2   :  { %13 = vsyncpa [#allocation6], 0 }
   0x3   :  { %14 = vsyncpa [#allocation4], 0 }
   0x4   :  { %16 = vsyncpa [#allocation4 + $0x1], 0  ;;  %s994_s18 = smov 0   ;;  %s996_s19 = smov 0  }
   0x5   :  { %s998_s20 = smov 0   ;;  %s1000_s21 = smov 0  }
   0x6 LB: > { %s1015_s22 = sadd.s32 4294967295, %s956_s21   ;;  %s710_s23 = sadd.s32 4294967294, %s956_s21   ;;  %s956_s21 = sphi %s1000_s21, %s1383_s21   ;;  %s952_s20 = sphi %s998_s20, %s1382_s20   ;;  %s948_s19 = sphi %s996_s19, %s1381_s19   ;;  %s944_s18 = sphi %s994_s18, %s1380_s18  }
   0x7   : > { %p42_p0 = scmp.ne.s32.totalorder %s948_s19, %s944_s18  ;;  %p43_p1 = scmp.eq.s32.totalorder %s1015_s22, 0 }
   0x8   : > { %p150_p2 = scmp.eq.s32.totalorder %s1015_s22, 3  ;;  %p156_p3 = scmp.eq.s32.totalorder %s710_s23, 3 }
   0x9   : > { %p1024_p4 = por %p43_p1, %p42_p0  ;;  %p711_p5 = scmp.ge.s32.totalorder %s956_s21, 1 }
   0xa   : > { %p1029_p6 = por %p156_p3, %p42_p0  ;;  %p163_p7 = scmp.lt.s32.totalorder %s956_s21, 5 }
   0xb   : > { %s174_s28 = sshll.u32 %s1368_s1, 4  ;;  %s958_s30 = smov [#allocation5]   ;;  %s175_s28 = int_to_ptr.hbm [resolvable:$true] %s174_s28 }
   0xc   : > { %p1037_p8 = pnand %p711_p5, %p163_p7  ;;  %s176_s6 = sshll.u32 %s958_s30, 4  ;;  %s177_s6 = int_to_ptr.vmem [resolvable:$true] %s176_s6 }
   0xd   : > { %s1046_s7 = sadd.s32 1, %s956_s21   ;;  %s1373_s8 = smov 128  }
   0xe   : > { %p768_p9 = pneg %p1037_p8  ;;  %s960_s9 = smov 8  }
   0xf   : > { %s26_s10 = ssub.s32 %s956_s21, %s1046_s7  ;;  %s29_s11 = sadd.s32 1, %s952_s20 }
  0x10   : > { %p769_p10 = pnand %p768_p9, %p43_p1  ;;  %p27_p11 = scmp.eq.s32.totalorder %s26_s10, 0 }
  0x11   : > { %p36_p12 = scmp.ne.s32.totalorder %s952_s20, %s948_s19  ;;  %p37_p13 = scmp.eq.s32.totalorder %s956_s21, 0 }
  0x12   : > { %771 = dma.hbm_to_vmem [thread:$0]  (!%p769_p10), %s175_s28, 6144, %s177_s6, [#allocation6], %s1373_s8, %s1373_s8, %s960_s9  }
  0x13   : > { %s1058_s12 = scalar_select %p27_p11, %s952_s20, %s29_s11  }
  0x14   : > { %p1062_p0 = por %p150_p2, %p36_p12  ;;  %p781_p3 = scmp.lt.s32.totalorder %s956_s21, 4 }
  0x15   : > { %s199_s14 = sand.u32 1, %s952_s20   ;;  %s726_s15 = sshll.u32 %s956_s21, 6 }
  0x16   : > { %p38_p5 = por %p37_p13, %p36_p12  ;;  %s714_s16 = sshll.u32 %s199_s14, 6 }
  0x17   : > { %s208_s26 = scalar_lea.hbm %s1367_s0, %s726_s15  ;;  %s203_s28 = scalar_lea.vmem [#allocation2], %s714_s16 }
  0x18   : > { %s209_s27 = sshll.u32 %s208_s26, 4  ;;  %s211_s30 = sshll.u32 %s203_s28, 4  ;;  %s210_s27 = int_to_ptr.hbm [resolvable:$true] %s209_s27  ;;  %s212_s30 = int_to_ptr.vmem [resolvable:$true] %s211_s30 }
  0x19   : > { %p1072_p7 = pnand %p781_p3, %p38_p5  ;;  %s200_s10 = scalar_lea.sflag [#allocation3], %s199_s14 }
  0x1a   : > { %s856_s11 = sshra.s32 %s210_s27, 4  ;;  %s863_s16 = scalar_lea.hbm %s1367_s0, 256  ;;  %s857_s11 = int_to_ptr.hbm [resolvable:$true] %s856_s11 }
  0x1b   : > { %s858_s8 = scalar_lea.hbm %s857_s11, 64  ;;  %p860_p9 = pneg %p1072_p7 }
  0x1c   : > { %p859_p2 = scmp.ne.s32.totalorder %s857_s11, %s858_s8  ;;  %p864_p12 = scmp.lt.s32.totalorder %s857_s11, %s1367_s0 }
  0x1d   : > { %p865_p13 = scmp.lt.s32.totalorder %s863_s16, %s858_s8 }
  0x1e   : > { %p861_p10 = pnand %p860_p9, %p859_p2 }
  0x1f   : > { %p866_p3 = por %p865_p13, %p864_p12 }
  0x20   : > { %p862_p11 = pneg %p861_p10 }
  0x22   : > { %p867_p5 = pnand %p866_p3, %p862_p11 }
  0x24   : > { %870 = shalt.err (!%p867_p5)
}
  0x25   : > { %s1379_s14 = smov 128   ;;  %223 = sbr.rel (%p1037_p8) target bundleno = 361 (0x169), region = 40 }
  0x26   : > { %775 = dma.hbm_to_vmem [thread:$0]  (!%p1072_p7), %s210_s27, 1024, %s212_s30, %s200_s10, %s1379_s14, %s1379_s14, %s960_s9  }
  0x27   : > { %s1092_s28 = sand.u32 (!%p1037_p8), 1, %s948_s19  }
  0x28   : > { %s718_s8 = sshll.u32 (!%p1037_p8), %s1092_s28, 6  ;;  %s226_s11 = scalar_lea.sflag (!%p1037_p8), [#allocation3], %s1092_s28 }
  0x29   : > { %s1098_s15 = scalar_lea.vmem (!%p1037_p8), [#allocation2], %s718_s8 }
  0x2a   : > { %931 = dma.done.wait (%p1024_p4), %s226_s11, 1024  }
  0x2b   : > { %933 = vsyncadd (%p1024_p4), %s226_s11, 4294966272 }
  0x2c   : > { %935 = dma.done.wait (%p43_p1), [#allocation6], 6144  }
  0x2d   : > { %937 = vsyncadd (%p43_p1), [#allocation6], 4294961152  ;;  %v961_v0 = vmov 0   ;;  %v366_v1 = vld [vmem:[%s1371_s4 + $0x10] sm:$0xff]  ;;  %v364_v2 = vld [vmem:[%s1371_s4] sm:$0xff]  ;;  %v280_v55 = vlaneseq  ;;  %s1324_s17 = scalar_lea.vmem [#allocation7], %s718_s8 }
  0x2e   : > { %823 = vset.pattern.permute.xlu1 %v961_v0  ;;  %822 = vset.pattern.permute.xlu0 %v961_v0  ;;  %v367_v3 = vld [vmem:[%s1371_s4 + $0x18] sm:$0xff]  ;;  %v365_v4 = vld [vmem:[%s1371_s4 + $0x8] sm:$0xff]  ;;  %v291_v5 = vld [vmem:[%s1370_s3] sm:$0xff]  ;;  %s727_s8 = sshll.u32 %s1015_s22, 6  ;;  %s624_s14 = sshll.u32 %s1324_s17, 4  ;;  %s625_s14 = int_to_ptr.vmem [resolvable:$true] %s624_s14 }
  0x2f   : > { %824 = vset.pattern.permute.xlu2 %v961_v0  ;;  %384 = vperm.xlu1 %823, %v366_v1   ;;  %v292_v6 = vld [vmem:[%s1370_s3 + $0x8] sm:$0xff]  ;;  %v1126_v7 = vld [vmem:[#allocation5 + $0xf8] sm:$0xff]  ;;  %v1128_v8 = vld [vmem:[#allocation5 + $0xf0] sm:$0xff]  ;;  %v1213_v0 = vshrl.u32 %v280_v55, 7  ;;  %s623_s26 = scalar_lea.hbm %s1372_s5, %s727_s8  ;;  %s612_s22 = scalar_lea.sflag [#allocation4], %s1092_s28 }
  0x30   : > { %374 = vperm.xlu0 %822, %v364_v2   ;;  %389 = vperm.xlu2 %824, %v367_v3   ;;  %v1131_v9 = vld [vmem:[#allocation5 + $0xe8] sm:$0xff]  ;;  %v435_v10 = vld [vmem:[#allocation5 + $0x78] sm:$0xff]  ;;  %v434_v11 = vld [vmem:[#allocation5 + $0x70] sm:$0xff]  ;;  %s626_s11 = sshll.u32 %s623_s26, 4  ;;  %s906_s24 = scalar_lea.hbm %s1372_s5, 256  ;;  %s627_s11 = int_to_ptr.hbm [resolvable:$true] %s626_s11 }
  0x31   : > { %513 = vmatpush.msra.mxu1 %v1126_v7  ;;  %728 = vmatpush.msra.mxu3 %v435_v10  ;;  %v1134_v12 = vld [vmem:[#allocation5 + $0xe0] sm:$0xff]  ;;  %v433_v13 = vld [vmem:[#allocation5 + $0x68] sm:$0xff]  ;;  %v293_v15 = vld [vmem:[%s1370_s3 + $0x10] sm:$0xff]  ;;  %vm282_vm0 = vcmp.lt.s32.totalorder %v1213_v0, 1  ;;  %vm355_vm1 = vcmp.lt.s32.totalorder %v1213_v0, 7  ;;  %s900_s29 = sshra.s32 %s627_s11, 4  ;;  %s901_s29 = int_to_ptr.hbm [resolvable:$true] %s900_s29 }
  0x32   : > { %472 = vmatpush.msra.mxu0 %v435_v10  ;;  %v368_v14 = vld [vmem:[%s1371_s4 + $0x20] sm:$0xff]  ;;  %v297_v16 = vld [vmem:[%s1370_s3 + $0x30] sm:$0xff]  ;;  %v1146_v17 = vld [vmem:[#allocation5 + $0xd8] sm:$0xff]  ;;  %s902_s9 = scalar_lea.hbm %s901_s29, 64  ;;  %p907_p7 = scmp.lt.s32.totalorder %s901_s29, %s1372_s5 }
  0x33   : > { %514 = vmatpush.msra.mxu1 %v1128_v8  ;;  %729 = vmatpush.msra.mxu3 %v434_v11  ;;  %v432_v18 = vld [vmem:[#allocation5 + $0x60] sm:$0xff]  ;;  %v467_v19 = vld [vmem:[#allocation5 + $0x178] sm:$0xff]  ;;  %v1149_v20 = vld [vmem:[#allocation5 + $0xd0] sm:$0xff]  ;;  %p903_p1 = scmp.ne.s32.totalorder %s901_s29, %s902_s9  ;;  %p908_p2 = scmp.lt.s32.totalorder %s906_s24, %s902_s9 }
  0x34   : > { %473 = vmatpush.msra.mxu0 %v434_v11  ;;  %v431_v21 = vld [vmem:[#allocation5 + $0x58] sm:$0xff]  ;;  %v466_v22 = vld [vmem:[#allocation5 + $0x170] sm:$0xff]  ;;  %v1152_v23 = vld [vmem:[#allocation5 + $0xc8] sm:$0xff]  ;;  %554 = vmatpush.msra.mxu2 %v467_v19 }
  0x35   : > { %515 = vmatpush.msra.mxu1 %v1131_v9  ;;  %730 = vmatpush.msra.mxu3 %v433_v13  ;;  %v430_v24 = vld [vmem:[#allocation5 + $0x50] sm:$0xff]  ;;  %v465_v25 = vld [vmem:[#allocation5 + $0x168] sm:$0xff]  ;;  %v1155_v26 = vld [vmem:[#allocation5 + $0xc0] sm:$0xff]  ;;  %p904_p4 = pnand %p903_p1, %p1062_p0  ;;  %p909_p9 = por %p908_p2, %p907_p7 }
  0x36   : > { %474 = vmatpush.msra.mxu0 %v433_v13  ;;  %555 = vmatpush.msra.mxu2 %v466_v22  ;;  %v369_v27 = vld [vmem:[%s1371_s4 + $0x28] sm:$0xff]  ;;  %v294_v28 = vld [vmem:[%s1370_s3 + $0x18] sm:$0xff]  ;;  %v464_v32 = vld [vmem:[#allocation5 + $0x160] sm:$0xff] }
  0x37   : > { %301 = vperm.xlu1 %823, %v291_v5   ;;  %516 = vmatpush.msra.mxu1 %v1134_v12  ;;  %v298_v29 = vld [vmem:[%s1370_s3 + $0x38] sm:$0xff]  ;;  %v429_v31 = vld [vmem:[#allocation5 + $0x48] sm:$0xff]  ;;  %v1170_v33 = vld [vmem:[#allocation5 + $0xb0] sm:$0xff]  ;;  %p905_p8 = pneg %p904_p4 }
  0x38   : > { %379 = vperm.xlu0 %822, %v365_v4   ;;  %306 = vperm.xlu2 %824, %v292_v6   ;;  %v1167_v30 = vld [vmem:[#allocation5 + $0xb8] sm:$0xff]  ;;  %v428_v34 = vld [vmem:[#allocation5 + $0x40] sm:$0xff]  ;;  %v1173_v36 = vld [vmem:[#allocation5 + $0xa8] sm:$0xff] }
  0x39   : > { %517 = vmatpush.msra.mxu1 %v1146_v17  ;;  %731 = vmatpush.msra.mxu3 %v432_v18  ;;  %v463_v35 = vld [vmem:[#allocation5 + $0x158] sm:$0xff]  ;;  %v462_v38 = vld [vmem:[#allocation5 + $0x150] sm:$0xff]  ;;  %v1176_v39 = vld [vmem:[#allocation5 + $0xa0] sm:$0xff]  ;;  %p910_p10 = pnand %p909_p9, %p905_p8 }
  0x3a   : > { %475 = vmatpush.msra.mxu0 %v432_v18  ;;  %556 = vmatpush.msra.mxu2 %v465_v25  ;;  %v427_v37 = vld [vmem:[#allocation5 + $0x38] sm:$0xff]  ;;  %v370_v40 = vld [vmem:[%s1371_s4 + $0x30] sm:$0xff]  ;;  %v295_v41 = vld [vmem:[%s1370_s3 + $0x20] sm:$0xff] }
  0x3b   : > { %518 = vmatpush.msra.mxu1 %v1149_v20  ;;  %732 = vmatpush.msra.mxu3 %v431_v21  ;;  %v371_v42 = vld [vmem:[%s1371_s4 + $0x38] sm:$0xff]  ;;  %v426_v44 = vld [vmem:[#allocation5 + $0x30] sm:$0xff]  ;;  %v461_v45 = vld [vmem:[#allocation5 + $0x148] sm:$0xff] }
  0x3c   : > { %476 = vmatpush.msra.mxu0 %v431_v21  ;;  %557 = vmatpush.msra.mxu2 %v464_v32  ;;  %v1188_v43 = vld [vmem:[#allocation5 + $0x98] sm:$0xff]  ;;  %v1191_v46 = vld [vmem:[#allocation5 + $0x90] sm:$0xff]  ;;  %v425_v47 = vld [vmem:[#allocation5 + $0x28] sm:$0xff] }
  0x3d   : > { %519 = vmatpush.msra.mxu1 %v1152_v23  ;;  %733 = vmatpush.msra.mxu3 %v430_v24  ;;  %v460_v48 = vld [vmem:[#allocation5 + $0x140] sm:$0xff]  ;;  %v1194_v49 = vld [vmem:[#allocation5 + $0x88] sm:$0xff]  ;;  %v423_v54 = vld [vmem:[#allocation5 + $0x18] sm:$0xff] }
  0x3e   : > { %477 = vmatpush.msra.mxu0 %v430_v24  ;;  %558 = vmatpush.msra.mxu2 %v463_v35  ;;  %v424_v50 = vld [vmem:[#allocation5 + $0x20] sm:$0xff]  ;;  %v296_v52 = vld [vmem:[%s1370_s3 + $0x28] sm:$0xff]  ;;  %v422_v56 = vld [vmem:[#allocation5 + $0x10] sm:$0xff] }
  0x3f   : > { %311 = vperm.xlu1 %823, %v293_v15   ;;  %520 = vmatpush.msra.mxu1 %v1155_v26  ;;  %v1197_v51 = vld [vmem:[#allocation5 + $0x80] sm:$0xff]  ;;  %v459_v57 = vld [vmem:[#allocation5 + $0x138] sm:$0xff]  ;;  %v421_v58 = vld [vmem:[#allocation5 + $0x8] sm:$0xff] }
  0x40   : > { %394 = vperm.xlu0 %822, %v368_v14   ;;  %331 = vperm.xlu2 %824, %v297_v16   ;;  %v1204_v53 = vld [vmem:[%s1098_s15] sm:$0xff]  ;;  %v1209_v59 = vld [vmem:[%s1098_s15 + $0x8] sm:$0xff]  ;;  %v458_v60 = vld [vmem:[#allocation5 + $0x130] sm:$0xff] }
  0x41   : > { %521 = vmatpush.msra.mxu1 %v1167_v30  ;;  %734 = vmatpush.msra.mxu3 %v429_v31  ;;  %v420_v61 = vld [vmem:[#allocation5] sm:$0xff]  ;;  %v457_v62 = vld [vmem:[#allocation5 + $0x128] sm:$0xff]  ;;  %v273_v63 = vrot.slane %v1209_v59, 7  ;;  %v272_v2 = vrot.slane %v1204_v53, 7  ;;  %v455_v4 = vld [vmem:[#allocation5 + $0x118] sm:$0xff]  ;;  %v348_v24 = vrot.slane %v1209_v59, 1 }
  0x42   : > { %478 = vmatpush.msra.mxu0 %v429_v31  ;;  %559 = vmatpush.msra.mxu2 %v462_v38  ;;  %v456_v1 = vld [vmem:[#allocation5 + $0x120] sm:$0xff]  ;;  %v1226_v5 = vld [vmem:[%s1098_s15 + $0x10] sm:$0xff]  ;;  %v1233_v10 = vld [vmem:[%s1098_s15 + $0x18] sm:$0xff] }
  0x43   : > { %522 = vmatpush.msra.mxu1 %v1170_v33  ;;  %735 = vmatpush.msra.mxu3 %v428_v34  ;;  %v1222_v3 = vsel %vm282_vm0, %v272_v2, %v273_v63  ;;  %v454_v6 = vld [vmem:[#allocation5 + $0x110] sm:$0xff]  ;;  %v274_v13 = vrot.slane %v1226_v5, 7  ;;  %v275_v19 = vrot.slane %v1233_v10, 7 }
  0x44   : > { %479 = vmatpush.msra.mxu0 %v428_v34  ;;  %560 = vmatpush.msra.mxu2 %v461_v45  ;;  %v1257_v14 = vld [vmem:[%s1098_s15 + $0x30] sm:$0xff] }
  0x45   : > { %523 = vmatpush.msra.mxu1 %v1173_v36  ;;  %736 = vmatpush.msra.mxu3 %v427_v37  ;;  %v288_v15 = vsel %vm282_vm0, %v273_v63, %v274_v13  ;;  %v278_v18 = vrot.slane %v1257_v14, 7  ;;  %v287_v21 = vsel %vm282_vm0, %v274_v13, %v275_v19 }
  0x46   : > { %480 = vmatpush.msra.mxu0 %v427_v37  ;;  %561 = vmatpush.msra.mxu2 %v460_v48 }
  0x47   : > { %316 = vperm.xlu1 %823, %v294_v28   ;;  %524 = vmatpush.msra.mxu1 %v1176_v39 }
  0x48   : > { %399 = vperm.xlu0 %822, %v369_v27   ;;  %336 = vperm.xlu2 %824, %v298_v29  }
  0x49   : > { %525 = vmatpush.msra.mxu1 %v1188_v43  ;;  %737 = vmatpush.msra.mxu3 %v426_v44 }
  0x4a   : > { %481 = vmatpush.msra.mxu0 %v426_v44  ;;  %562 = vmatpush.msra.mxu2 %v459_v57  ;;  %v350_v44 = vrot.slane %v1233_v10, 1 }
  0x4b   : > { %526 = vmatpush.msra.mxu1 %v1191_v46  ;;  %738 = vmatpush.msra.mxu3 %v425_v47 }
  0x4c   : > { %482 = vmatpush.msra.mxu0 %v425_v47  ;;  %563 = vmatpush.msra.mxu2 %v458_v60 }
  0x4d   : > { %527 = vmatpush.msra.mxu1 %v1194_v49  ;;  %739 = vmatpush.msra.mxu3 %v424_v50 }
  0x4e   : > { %483 = vmatpush.msra.mxu0 %v424_v50  ;;  %564 = vmatpush.msra.mxu2 %v457_v62 }
  0x4f   : > { %321 = vperm.xlu1 %823, %v295_v41   ;;  %528 = vmatpush.msra.mxu1 %v1197_v51 }
  0x50   : > { %404 = vperm.xlu0 %822, %v370_v40   ;;  %409 = vperm.xlu2 %824, %v371_v42  }
  0x51   : > { %529 = vmatmul.f32.vlgmr.msra.gmra.mxu1 %v1204_v53  ;;  %740 = vmatpush.msra.mxu3 %v423_v54 }
  0x52   : > { %484 = vmatpush.msra.mxu0 %v423_v54  ;;  %565 = vmatpush.msra.mxu2 %v456_v1 }
  0x53   : > { %741 = vmatpush.msra.mxu3 %v422_v56 }
  0x54   : > { %485 = vmatpush.msra.mxu0 %v422_v56  ;;  %566 = vmatpush.msra.mxu2 %v455_v4 }
  0x55   : > { %742 = vmatpush.msra.mxu3 %v421_v58 }
  0x56   : > { %486 = vmatpush.msra.mxu0 %v421_v58  ;;  %567 = vmatpush.msra.mxu2 %v454_v6 }
  0x57   : > { %743 = vmatpush.msra.mxu3 %v420_v61 }
  0x58   : > { %326 = vperm.xlu0 %822, %v296_v52   ;;  %487 = vmatpush.msra.mxu0 %v420_v61  ;;  %v353_v61 = vrot.slane %v1257_v14, 1 }
  0x59   : > { %532 = vmatmul.f32.gmra.mxu1 %v1209_v59  ;;  %744 = vmatpush.msrb.mxu3 %v1126_v7  ;;  %v453_v7 = vld [vmem:[#allocation5 + $0x108] sm:$0xff] }
  0x5a   : > { %568 = vmatpush.msra.mxu2 %v453_v7 }
  0x5b   : > { %745 = vmatpush.msrb.mxu3 %v1128_v8  ;;  %v1241_v8 = vld [vmem:[%s1098_s15 + $0x20] sm:$0xff] }
  0x5c   : > { %v276_v29 = vrot.slane %v1241_v8, 7  ;;  %v351_v50 = vrot.slane %v1241_v8, 1 }
  0x5d   : > { %746 = vmatpush.msrb.mxu3 %v1131_v9  ;;  %v452_v9 = vld [vmem:[#allocation5 + $0x100] sm:$0xff] }
  0x5e   : > { %569 = vmatpush.msra.mxu2 %v452_v9 }
  0x5f   : > { %747 = vmatpush.msrb.mxu3 %v1134_v12  ;;  %v1250_v12 = vld [vmem:[%s1098_s15 + $0x28] sm:$0xff] }
  0x60   : > { %v352_v55 = vrot.slane %v1250_v12, 1 }
  0x61   : > { %535 = vmatmul.f32.gmra.mxu1 %v1226_v5  ;;  %748 = vmatpush.msrb.mxu3 %v1146_v17  ;;  %v277_v17 = vrot.slane %v1250_v12, 7 }
  0x62   : > { %v358_v58 = vsel %vm355_vm1, %v351_v50, %v352_v55  ;;  %v357_v63 = vsel %vm355_vm1, %v352_v55, %v353_v61 }
  0x63   : > { %749 = vmatpush.msrb.mxu3 %v1149_v20  ;;  %v284_v20 = vsel %vm282_vm0, %v277_v17, %v278_v18  ;;  %v285_v7 = vsel %vm282_vm0, %v276_v29, %v277_v17 }
  0x65   : > { %750 = vmatpush.msrb.mxu3 %v1152_v23  ;;  %v347_v23 = vrot.slane %v1204_v53, 1 }
  0x67   : > { %751 = vmatpush.msrb.mxu3 %v1155_v26  ;;  %v1274_v26 = vld [vmem:[%s1098_s15 + $0x38] sm:$0xff]  ;;  %v362_v28 = vsel %vm355_vm1, %v347_v23, %v348_v24 }
  0x68   : > { %v279_v27 = vrot.slane %v1274_v26, 7  ;;  %v354_v4 = vrot.slane %v1274_v26, 1 }
  0x69   : > { %538 = vmatmul.f32.gmra.mxu1 %v1233_v10  ;;  %752 = vmatpush.msrb.mxu3 %v1167_v30 }
  0x6a   : > { %v283_v30 = vsel %vm282_vm0, %v278_v18, %v279_v27 }
  0x6b   : > { %753 = vmatpush.msrb.mxu3 %v1170_v33  ;;  %v286_v33 = vsel %vm282_vm0, %v275_v19, %v276_v29 }
  0x6d   : > { %754 = vmatpush.msrb.mxu3 %v1173_v36  ;;  %v349_v36 = vrot.slane %v1226_v5, 1  ;;  %v356_v5 = vsel %vm355_vm1, %v353_v61, %v354_v4 }
  0x6f   : > { %755 = vmatpush.msrb.mxu3 %v1176_v39  ;;  %v361_v38 = vsel %vm355_vm1, %v348_v24, %v349_v36  ;;  %v290_v39 = vsel %vm282_vm0, %v279_v27, %v272_v2  ;;  %v360_v45 = vsel %vm355_vm1, %v349_v36, %v350_v44 }
  0x71   : > { %541 = vmatmul.f32.gmra.mxu1 %v1241_v8  ;;  %756 = vmatpush.msrb.mxu3 %v1188_v43 }
  0x73   : > { %757 = vmatpush.msrb.mxu3 %v1191_v46 }
  0x75   : > { %758 = vmatpush.msrb.mxu3 %v1194_v49 }
  0x77   : > { %759 = vmatpush.msrb.mxu3 %v1197_v51  ;;  %v359_v51 = vsel %vm355_vm1, %v350_v44, %v351_v50 }
  0x79   : > { %544 = vmatmul.f32.gmra.mxu1 %v1250_v12  ;;  %v825_v12 = vld [vmem:[%s1369_s2] ss:$0 sm:$0xff] }
  0x81   : > { %547 = vmatmul.f32.gmra.mxu1 %v1257_v14 }
  0x8a   : > { %v390_v11 = vpop.permute.xlu2 %389 }
  0x8b   : > { %v415_v52 = vmul.f32 %v390_v11, %v359_v51  ;;  %v363_v11 = vsel %vm355_vm1, %v354_v4, %v347_v23 }
  0x92   : > { %v307_v16 = vpop.permute.xlu2 %306 }
  0x93   : > { %v340_v46 = vmul.f32 %v307_v16, %v1222_v3 }
  0x9a   : > { %v332_v22 = vpop.permute.xlu2 %331 }
  0x9b   : > { %v345_v25 = vmul.f32 %v332_v22, %v284_v20 }
  0x9d   : > { %506 = vmatmul.f32.vlgmr.msra.gmra.mxu3 %v345_v25 }
  0xa1   : > { %v385_v31 = vpop.permute.xlu1 %384 }
  0xa2   : > { %v375_v32 = vpop.permute.xlu0 %374  ;;  %v337_v35 = vpop.permute.xlu2 %336  ;;  %v414_v48 = vmul.f32 %v385_v31, %v360_v45 }
  0xa3   : > { %v412_v34 = vmul.f32 %v375_v32, %v362_v28  ;;  %v346_v37 = vmul.f32 %v337_v35, %v283_v30 }
  0xa5   : > { %570 = vmatmul.f32.vlgmr.msra.gmra.mxu2 %v412_v34  ;;  %509 = vmatmul.f32.gmra.mxu3 %v346_v37 }
  0xa9   : > { %v302_v41 = vpop.permute.xlu1 %301 }
  0xaa   : > { %v380_v40 = vpop.permute.xlu0 %379  ;;  %v339_v43 = vmul.f32 %v302_v41, %v290_v39  ;;  %v410_v9 = vpop.permute.xlu2 %409 }
  0xab   : > { %v413_v42 = vmul.f32 %v380_v40, %v361_v38  ;;  %v419_v13 = vmul.f32 %v410_v9, %v363_v11 }
  0xac   : > { %488 = vmatmul.f32.vlgmr.msra.gmra.mxu0 %v339_v43 }
  0xad   : > { %573 = vmatmul.f32.gmra.mxu2 %v413_v42  ;;  %550 = vmatmul.f32.vlgmr.msrb.gmra.mxu3 %v1274_v26 }
  0xb1   : > { %v312_v49 = vpop.permute.xlu1 %311 }
  0xb2   : > { %v395_v47 = vpop.permute.xlu0 %394  ;;  %v341_v54 = vmul.f32 %v312_v49, %v288_v15 }
  0xb3   : > { %v416_v59 = vmul.f32 %v395_v47, %v358_v58 }
  0xb4   : > { %491 = vmatmul.f32.gmra.mxu0 %v340_v46 }
  0xb5   : > { %576 = vmatmul.f32.gmra.mxu2 %v414_v48 }
  0xb9   : > { %v317_v57 = vpop.permute.xlu1 %316 }
  0xba   : > { %v400_v56 = vpop.permute.xlu0 %399  ;;  %v342_v60 = vmul.f32 %v317_v57, %v287_v21 }
  0xbb   : > { %v417_v2 = vmul.f32 %v400_v56, %v357_v63 }
  0xbc   : > { %494 = vmatmul.f32.gmra.mxu0 %v341_v54 }
  0xbd   : > { %579 = vmatmul.f32.gmra.mxu2 %v415_v52 }
  0xc1   : > { %v322_v1 = vpop.permute.xlu1 %321 }
  0xc2   : > { %v405_v62 = vpop.permute.xlu0 %404  ;;  %v343_v3 = vmul.f32 %v322_v1, %v286_v33 }
  0xc3   : > { %v418_v10 = vmul.f32 %v405_v62, %v356_v5 }
  0xc4   : > { %497 = vmatmul.f32.gmra.mxu0 %v342_v60 }
  0xc5   : > { %582 = vmatmul.f32.gmra.mxu2 %v416_v59 }
  0xca   : > { %v327_v6 = vpop.permute.xlu0 %326 }
  0xcb   : > { %v344_v8 = vmul.f32 %v327_v6, %v285_v7 }
  0xcc   : > { %500 = vmatmul.f32.gmra.mxu0 %v343_v3 }
  0xcd   : > { %585 = vmatmul.f32.gmra.mxu2 %v417_v2 }
  0xce   : > { %v530_v14 = vpop.f32.mrf.mxu1 }
  0xd4   : > { %503 = vmatmul.f32.gmra.mxu0 %v344_v8 }
  0xd5   : > { %588 = vmatmul.f32.gmra.mxu2 %v418_v10 }
  0xd6   : > { %v533_v15 = vpop.f32.mrf.mxu1 }
  0xdd   : > { %591 = vmatmul.f32.gmra.mxu2 %v419_v13 }
  0xde   : > { %v536_v19 = vpop.f32.mrf.mxu1 }
  0xe6   : > { %v539_v25 = vpop.f32.mrf.mxu1 }
  0xee   : > { %v542_v33 = vpop.f32.mrf.mxu1 }
  0xf6   : > { %v545_v43 = vpop.f32.mrf.mxu1 }
  0xfe   : > { %v548_v55 = vpop.f32.mrf.mxu1 }
 0x120   : > { %v507_v40 = vpop.f32.mrf.mxu3 }
 0x121   : > { %v508_v52 = vadd.f32 %v825_v12, %v507_v40 }
 0x123   : > { %v549_v57 = vadd.f32 %v548_v55, %v508_v52 }
 0x128   : > { %v571_v16 = vpop.f32.mrf.mxu2  ;;  %v510_v50 = vpop.f32.mrf.mxu3 }
 0x129   : > { %v489_v17 = vpop.f32.mrf.mxu0  ;;  %v511_v62 = vadd.f32 %v825_v12, %v510_v50 }
 0x12a   : > { %v490_v18 = vadd.f32 %v825_v12, %v489_v17 }
 0x12c   : > { %v531_v20 = vadd.f32 %v530_v14, %v490_v18 }
 0x12e   : > { %v572_v21 = vadd.f32 %v571_v16, %v531_v20 }
 0x130   : > { %v574_v22 = vpop.f32.mrf.mxu2  ;;  %v595_v53 = vmax.f32 %v572_v21, 0.0  ;;  %v551_v1 = vpop.f32.mrf.mxu3 }
 0x131   : > { %v492_v24 = vpop.f32.mrf.mxu0  ;;  %v552_v2 = vadd.f32 %v551_v1, %v511_v62 }
 0x132   : > { %603 = vst [vmem:[%s1324_s17] sm:$0xff] %v595_v53  ;;  %v493_v0 = vadd.f32 %v825_v12, %v492_v24 }
 0x134   : > { %v534_v23 = vadd.f32 %v533_v15, %v493_v0 }
 0x136   : > { %v575_v26 = vadd.f32 %v574_v22, %v534_v23 }
 0x138   : > { %v577_v27 = vpop.f32.mrf.mxu2  ;;  %v596_v28 = vmax.f32 %v575_v26, 0.0 }
 0x139   : > { %v495_v29 = vpop.f32.mrf.mxu0 }
 0x13a   : > { %604 = vst [vmem:[%s1324_s17 + $0x8] sm:$0xff] %v596_v28  ;;  %v496_v30 = vadd.f32 %v825_v12, %v495_v29 }
 0x13c   : > { %v537_v31 = vadd.f32 %v536_v19, %v496_v30 }
 0x13e   : > { %v578_v32 = vadd.f32 %v577_v27, %v537_v31 }
 0x140   : > { %v580_v34 = vpop.f32.mrf.mxu2  ;;  %v597_v35 = vmax.f32 %v578_v32, 0.0 }
 0x141   : > { %v498_v36 = vpop.f32.mrf.mxu0 }
 0x142   : > { %605 = vst [vmem:[%s1324_s17 + $0x10] sm:$0xff] %v597_v35  ;;  %v499_v37 = vadd.f32 %v825_v12, %v498_v36 }
 0x144   : > { %v540_v38 = vadd.f32 %v539_v25, %v499_v37 }
 0x146   : > { %v581_v39 = vadd.f32 %v580_v34, %v540_v38 }
 0x148   : > { %v583_v41 = vpop.f32.mrf.mxu2  ;;  %v598_v42 = vmax.f32 %v581_v39, 0.0 }
 0x149   : > { %v501_v44 = vpop.f32.mrf.mxu0 }
 0x14a   : > { %606 = vst [vmem:[%s1324_s17 + $0x18] sm:$0xff] %v598_v42  ;;  %v502_v45 = vadd.f32 %v825_v12, %v501_v44 }
 0x14c   : > { %v543_v46 = vadd.f32 %v542_v33, %v502_v45 }
 0x14e   : > { %v584_v47 = vadd.f32 %v583_v41, %v543_v46 }
 0x150   : > { %v586_v48 = vpop.f32.mrf.mxu2  ;;  %v599_v49 = vmax.f32 %v584_v47, 0.0 }
 0x151   : > { %v504_v51 = vpop.f32.mrf.mxu0 }
 0x152   : > { %607 = vst [vmem:[%s1324_s17 + $0x20] sm:$0xff] %v599_v49  ;;  %v505_v54 = vadd.f32 %v825_v12, %v504_v51 }
 0x154   : > { %v546_v56 = vadd.f32 %v545_v43, %v505_v54 }
 0x156   : > { %v587_v58 = vadd.f32 %v586_v48, %v546_v56 }
 0x158   : > { %v589_v59 = vpop.f32.mrf.mxu2  ;;  %v600_v60 = vmax.f32 %v587_v58, 0.0 }
 0x159   : > { %v590_v61 = vadd.f32 %v589_v59, %v549_v57 }
 0x15a   : > { %608 = vst [vmem:[%s1324_s17 + $0x28] sm:$0xff] %v600_v60 }
 0x15b   : > { %v601_v63 = vmax.f32 %v590_v61, 0.0 }
 0x15d   : > { %609 = vst [vmem:[%s1324_s17 + $0x30] sm:$0xff] %v601_v63 }
 0x160   : > { %v592_v3 = vpop.f32.mrf.mxu2 }
 0x161   : > { %v593_v4 = vadd.f32 %v592_v3, %v552_v2 }
 0x163   : > { %v602_v5 = vmax.f32 %v593_v4, 0.0 }
 0x165   : > { %610 = vst [vmem:[%s1324_s17 + $0x38] sm:$0xff] %v602_v5 }
 0x166   : > { %913 = shalt.err (!%p910_p10)
}
 0x167   : > { %s962_s28 = smov 128   ;;  %s963_s10 = smov 8  }
 0x168   : > { %766 = dma.vmem_to_hbm [thread:$0]  (%p1062_p0), %s625_s14, 1024, %s627_s11, %s612_s22, %s962_s28, %s962_s28, %s963_s10  }
 0x169 PF: > { %p783_p11 = scmp.ge.s32.totalorder %s956_s21, 2  ;;  %s641_s17 = sand.u32 1, %s944_s18  }
 0x16a   : > { %s642_s8 = scalar_lea.sflag [#allocation4], %s641_s17 }
 0x16b   : > { %p777_p12 = pnand %p783_p11, %p1029_p6 }
 0x16d   : > { %p778_p13 = pneg %p777_p12 }
 0x16f   : > { %939 = dma.done.wait (%p778_p13), %s642_s8, 1024  }
 0x170   : > { %941 = vsyncadd (%p778_p13), %s642_s8, 4294966272  ;;  %p19_p3 = scmp.ge.s32.totalorder %s1046_s7, 6   ;;  %s1380_s18 = smov %s948_s19 }
 0x171   : > { %s1381_s19 = smov %s952_s20  ;;  %s1382_s20 = smov %s1058_s12 }
 0x172   : > { %s1383_s21 = smov %s1046_s7  ;;  %21 = sbr.rel (!%p19_p3) target bundleno = 6 (0x6), region = 89 }
 0x177   :  { %648 = vsyncpa [#allocation3], 1 }
 0x178   :  { %650 = vsyncpa [#allocation3 + $0x1], 1 }
 0x179   :  { %651 = vsyncpa [#allocation6], 1 }
 0x17a   :  { %652 = vsyncpa [#allocation4], 1 }
 0x17b   :  { %654 = vsyncpa [#allocation4 + $0x1], 1 }

</bundles_post_ra>
